<compile_context>
chip_gen: v5e
topology: v5e:2x2
jax: 0.10.0
libtpu: 0.0.40
codegen_flags: <defaults>
</compile_context>

<pallas_src>
import functools
import math

import jax
import jax.numpy as jnp
from jax.experimental import pallas as pl
from jax.experimental.pallas import tpu as pltpu

EPS = 1e-6


def _vmem_limit_bytes():
    # ~3/4 of physical VMEM, capped at 100 MiB; falls back to 48 MiB (safe on v7x).
    try:
        cap = pltpu.get_tpu_info().vmem_capacity_bytes
    except Exception:
        cap = 64 * 1024 * 1024
    return int(min(cap * 3 // 4, 100 * 1024 * 1024))


VMEM_LIMIT = _vmem_limit_bytes()


def _cparams(sem):
    return pltpu.CompilerParams(dimension_semantics=sem,
                                vmem_limit_bytes=VMEM_LIMIT)


def _largest_tile(dim, target, granule):
    """Largest divisor of `dim` that is <= target and a multiple of `granule`
    (or the full dim)."""
    cap = min(target, dim)
    for cand in range(cap, 0, -1):
        if dim % cand == 0 and (cand % granule == 0 or cand == dim):
            return cand
    return dim


# ----------------------------- Pallas kernels -------------------------------

def ln_matmul_kernel(x_ref, w_ref, b_ref, g_ref, o_ref, xn_ref):
    # grid = (M//tm, N//tn), j (N) is the inner 'arbitrary' axis.
    # LN of the (tm, D) row block is computed once at j==0 and cached (bf16) in xn_ref.
    @pl.when(pl.program_id(1) == 0)
    def _():
        x = x_ref[...].astype(jnp.float32)
        d = x.shape[-1]
        mean = jnp.mean(x, axis=-1, keepdims=True)
        # torch.std() default: unbiased (divide by n-1); eps added to std (not var)
        var = jnp.sum((x - mean) ** 2, axis=-1, keepdims=True) / float(d - 1)
        inv = 1.0 / (jnp.sqrt(var) + EPS)            # exact (once per row, cheap)
        xn_ref[...] = (g_ref[0] * (x - mean) * inv + g_ref[1]).astype(xn_ref.dtype)

    y = jnp.dot(xn_ref[...], w_ref[...], preferred_element_type=jnp.float32)
    o_ref[...] = (y + b_ref[...]).astype(o_ref.dtype)


def matmul_residual_k1_kernel(x_ref, w_ref, b_ref, r_ref, o_ref):
    # Single-K-step specialization: out = residual + x @ w + b, no accumulator scratch.
    y = jnp.dot(x_ref[...], w_ref[...], preferred_element_type=jnp.float32)
    o_ref[...] = (y + b_ref[...] + r_ref[...].astype(jnp.float32)).astype(o_ref.dtype)


def matmul_residual_kernel(x_ref, w_ref, b_ref, r_ref, o_ref, acc_ref):
    # out = residual + x @ w + b, accumulated over the K grid axis.
    @pl.when(pl.program_id(2) == 0)
    def _():
        acc_ref[...] = jnp.zeros_like(acc_ref)

    acc_ref[...] += jnp.dot(x_ref[...], w_ref[...],
                            preferred_element_type=jnp.float32)

    @pl.when(pl.program_id(2) == pl.num_programs(2) - 1)
    def _():
        out = acc_ref[...] + b_ref[...] + r_ref[...].astype(jnp.float32)
        o_ref[...] = out.astype(o_ref.dtype)


def ffn_kernel(x_ref, w1_ref, b1_ref, w2_ref, b2_ref, g_ref, o_ref, acc_ref, xn_ref):
    # Fused FFN: out = x + relu(LN(x) @ w1 + b1) @ w2 + b2
    # grid = (M//tm, d_ff//tkf); the d_ff axis is 'arbitrary' and streamed;
    # the (B*S, d_ff) hidden activation never leaves VMEM.
    kf = pl.program_id(1)

    @pl.when(kf == 0)
    def _():
        x = x_ref[...].astype(jnp.float32)
        d = x.shape[-1]
        mean = jnp.mean(x, axis=-1, keepdims=True)
        var = jnp.sum((x - mean) ** 2, axis=-1, keepdims=True) / float(d - 1)
        inv = 1.0 / (jnp.sqrt(var) + EPS)
        xn_ref[...] = (g_ref[0] * (x - mean) * inv + g_ref[1]).astype(xn_ref.dtype)
        acc_ref[...] = jnp.zeros_like(acc_ref)

    h = jnp.dot(xn_ref[...], w1_ref[...], preferred_element_type=jnp.float32)
    h = jnp.maximum(h + b1_ref[...], 0.0)
    acc_ref[...] += jnp.dot(h.astype(w2_ref.dtype), w2_ref[...],
                            preferred_element_type=jnp.float32)

    @pl.when(kf == pl.num_programs(1) - 1)
    def _():
        out = acc_ref[...] + b2_ref[...] + x_ref[...].astype(jnp.float32)
        o_ref[...] = out.astype(o_ref.dtype)


def attn_head_kernel(q_ref, k_ref, v_ref, bias_ref, o_ref, *, scale):
    # One (batch, head) per grid step; q/k/v are lane-dense (S, dh) tiles (dh % 128 == 0).
    q = q_ref[0] * scale                           # scale folded into q (bf16)
    k = k_ref[0]
    v = v_ref[0]
    bias = bias_ref[0].astype(jnp.float32)         # (1, S) additive 0 / -1e9
    # q @ k.T without an explicit transpose: contract the last dims.
    s = jax.lax.dot_general(q, k, (((1,), (1,)), ((), ())),
                            preferred_element_type=jnp.float32) + bias
    s = s - jnp.max(s, axis=-1, keepdims=True)
    p = jnp.exp(s)
    p = p * pl.reciprocal(jnp.sum(p, axis=-1, keepdims=True), approx=True)
    o = jnp.dot(p.astype(v.dtype), v, preferred_element_type=jnp.float32)
    o_ref[0] = o.astype(o_ref.dtype)
    # TODO(synk): for long sequences add KV-block online-softmax (flash) tiling; the per-head
    # (S,S) score tile is fine at these sizes but will not fit v7x VMEM at S in the thousands.


def attn_batch_kernel(qkv_ref, bias_ref, o_ref, *, num_heads, scale):
    # Fallback (dh not a lane multiple): one batch element per grid step, all heads here.
    qkv = qkv_ref[0]                               # (S, 3D) bf16
    bias = bias_ref[0].astype(jnp.float32)         # (1, S)
    d3 = qkv.shape[-1]
    d = d3 // 3
    dh = d // num_heads
    for h in range(num_heads):                     # static slices, unrolled
        q = qkv[:, h * dh:(h + 1) * dh] * scale
        k = qkv[:, d + h * dh:d + (h + 1) * dh]
        v = qkv[:, 2 * d + h * dh:2 * d + (h + 1) * dh]
        s = jax.lax.dot_general(q, k, (((1,), (1,)), ((), ())),
                                preferred_element_type=jnp.float32) + bias
        s = s - jnp.max(s, axis=-1, keepdims=True)
        p = jnp.exp(s)
        p = p * pl.reciprocal(jnp.sum(p, axis=-1, keepdims=True), approx=True)
        o = jnp.dot(p.astype(v.dtype), v, preferred_element_type=jnp.float32)
        o_ref[0, :, h * dh:(h + 1) * dh] = o.astype(o_ref.dtype)


def layernorm_kernel(x_ref, g_ref, o_ref):
    x = x_ref[...].astype(jnp.float32)
    d = x.shape[-1]
    mean = jnp.mean(x, axis=-1, keepdims=True)
    var = jnp.sum((x - mean) ** 2, axis=-1, keepdims=True) / float(d - 1)
    inv = 1.0 / (jnp.sqrt(var) + EPS)
    o_ref[...] = (g_ref[0] * (x - mean) * inv + g_ref[1]).astype(o_ref.dtype)


# ----------------------------- pallas_call wrappers --------------------------

def pallas_ln_matmul(x2d, norm, w, b, tm_target=256, tn_target=512):
    M, D = x2d.shape
    N = w.shape[1]
    tm = _largest_tile(M, tm_target, 8)
    tn = _largest_tile(N, tn_target, 128)
    return pl.pallas_call(
        ln_matmul_kernel,
        out_shape=jax.ShapeDtypeStruct((M, N), jnp.bfloat16),
        grid=(M // tm, N // tn),
        in_specs=[
            pl.BlockSpec((tm, D), lambda i, j: (i, 0)),
            pl.BlockSpec((D, tn), lambda i, j: (0, j)),
            pl.BlockSpec((1, tn), lambda i, j: (0, j)),
            pl.BlockSpec(memory_space=pltpu.MemorySpace.SMEM),
        ],
        out_specs=pl.BlockSpec((tm, tn), lambda i, j: (i, j)),
        scratch_shapes=[pltpu.VMEM((tm, D), jnp.bfloat16)],   # cached LN(x) row block
        compiler_params=_cparams(("parallel", "arbitrary")),
    )(x2d, w, b.reshape(1, N), norm)


def pallas_matmul_residual(x2d, w, b, res2d,
                           tm_target=256, tn_target=512, tk_target=512):
    M, K = x2d.shape
    N = w.shape[1]
    tm = _largest_tile(M, tm_target, 8)
    tn = _largest_tile(N, tn_target, 128)
    tk = _largest_tile(K, tk_target, 128)
    if K // tk == 1:
        return pl.pallas_call(
            matmul_residual_k1_kernel,
            out_shape=jax.ShapeDtypeStruct((M, N), res2d.dtype),
            grid=(M // tm, N // tn),
            in_specs=[
                pl.BlockSpec((tm, K), lambda i, j: (i, 0)),
                pl.BlockSpec((K, tn), lambda i, j: (0, j)),
                pl.BlockSpec((1, tn), lambda i, j: (0, j)),
                pl.BlockSpec((tm, tn), lambda i, j: (i, j)),
            ],
            out_specs=pl.BlockSpec((tm, tn), lambda i, j: (i, j)),
            compiler_params=_cparams(("parallel", "parallel")),
        )(x2d, w, b.reshape(1, N), res2d)
    return pl.pallas_call(
        matmul_residual_kernel,
        out_shape=jax.ShapeDtypeStruct((M, N), res2d.dtype),
        grid=(M // tm, N // tn, K // tk),
        in_specs=[
            pl.BlockSpec((tm, tk), lambda i, j, k: (i, k)),
            pl.BlockSpec((tk, tn), lambda i, j, k: (k, j)),
            pl.BlockSpec((1, tn), lambda i, j, k: (0, j)),
            pl.BlockSpec((tm, tn), lambda i, j, k: (i, j)),
        ],
        out_specs=pl.BlockSpec((tm, tn), lambda i, j, k: (i, j)),
        scratch_shapes=[pltpu.VMEM((tm, tn), jnp.float32)],
        compiler_params=_cparams(("parallel", "parallel", "arbitrary")),
    )(x2d, w, b.reshape(1, N), res2d)


def pallas_ffn(x2d, norm, w1, b1, w2, b2, tm_target=256, tkf_target=512):
    M, D = x2d.shape
    F = w1.shape[1]
    tm = _largest_tile(M, tm_target, 8)
    tkf = _largest_tile(F, tkf_target, 128)
    return pl.pallas_call(
        ffn_kernel,
        out_shape=jax.ShapeDtypeStruct((M, D), x2d.dtype),
        grid=(M // tm, F // tkf),
        in_specs=[
            pl.BlockSpec((tm, D), lambda i, kf: (i, 0)),      # x: LN input + residual
            pl.BlockSpec((D, tkf), lambda i, kf: (0, kf)),    # w1 (streamed over d_ff)
            pl.BlockSpec((1, tkf), lambda i, kf: (0, kf)),    # b1
            pl.BlockSpec((tkf, D), lambda i, kf: (kf, 0)),    # w2 (streamed over d_ff)
            pl.BlockSpec((1, D), lambda i, kf: (0, 0)),       # b2
            pl.BlockSpec(memory_space=pltpu.MemorySpace.SMEM),
        ],
        out_specs=pl.BlockSpec((tm, D), lambda i, kf: (i, 0)),
        scratch_shapes=[pltpu.VMEM((tm, D), jnp.float32),     # f32 accumulator
                        pltpu.VMEM((tm, D), jnp.bfloat16)],   # cached LN(x)
        compiler_params=_cparams(("parallel", "arbitrary")),
    )(x2d, w1, b1.reshape(1, F), w2, b2.reshape(1, D), norm)


def pallas_attention(qkv, mask_bias, num_heads):
    B, S, D3 = qkv.shape
    D = D3 // 3
    dh = D // num_heads
    scale = 1.0 / math.sqrt(dh)
    if dh % 128 == 0 and S % 8 == 0:
        # Head-parallel path: lane-dense (S, dh) tiles per (batch, head) grid step.
        kern = functools.partial(attn_head_kernel, scale=scale)
        return pl.pallas_call(
            kern,
            out_shape=jax.ShapeDtypeStruct((B, S, D), qkv.dtype),
            grid=(B, num_heads),
            in_specs=[
                pl.BlockSpec((1, S, dh), lambda b, h: (b, 0, h)),                   # q
                pl.BlockSpec((1, S, dh), lambda b, h: (b, 0, h + num_heads)),       # k
                pl.BlockSpec((1, S, dh), lambda b, h: (b, 0, h + 2 * num_heads)),   # v
                pl.BlockSpec((1, 1, S), lambda b, h: (b, 0, 0)),
            ],
            out_specs=pl.BlockSpec((1, S, dh), lambda b, h: (b, 0, h)),
            compiler_params=_cparams(("parallel", "parallel")),
        )(qkv, qkv, qkv, mask_bias)
    # Fallback: all heads per batch step (used when dh is not a lane multiple).
    kern = functools.partial(attn_batch_kernel, num_heads=num_heads, scale=scale)
    return pl.pallas_call(
        kern,
        out_shape=jax.ShapeDtypeStruct((B, S, D), qkv.dtype),
        grid=(B,),
        in_specs=[
            pl.BlockSpec((1, S, D3), lambda b: (b, 0, 0)),
            pl.BlockSpec((1, 1, S), lambda b: (b, 0, 0)),
        ],
        out_specs=pl.BlockSpec((1, S, D), lambda b: (b, 0, 0)),
        compiler_params=_cparams(("parallel",)),
    )(qkv, mask_bias)


def pallas_layernorm(x2d, norm, tm_target=512):
    M, D = x2d.shape
    tm = _largest_tile(M, tm_target, 8)
    return pl.pallas_call(
        layernorm_kernel,
        out_shape=jax.ShapeDtypeStruct((M, D), x2d.dtype),
        grid=(M // tm,),
        in_specs=[
            pl.BlockSpec((tm, D), lambda i: (i, 0)),
            pl.BlockSpec(memory_space=pltpu.MemorySpace.SMEM),
        ],
        out_specs=pl.BlockSpec((tm, D), lambda i: (i, 0)),
        compiler_params=_cparams(("parallel",)),
    )(x2d, norm)


# ----------------------------- model forward ---------------------------------

def encoder_forward(x, mask, params, num_heads):
    B, S, D = x.shape
    # additive attention bias computed once and reused by every layer/head:
    # 0 where attend, -1e9 where padded
    mask_bias = ((mask.reshape(B, 1, S) - 1.0) * 1e9).astype(jnp.float32)
    x2d = x.reshape(B * S, D)          # residual stream stays f32

    for layer in params["layers"]:
        # residual 1: x + self_attn(norm(x)) — LN fused into the QKV matmul (cached across
        # N tiles), residual fused into the output projection; qkv/attn kept in bf16.
        qkv = pallas_ln_matmul(x2d, layer["norm1"], layer["wqkv"], layer["bqkv"])
        attn = pallas_attention(qkv.reshape(B, S, 3 * D), mask_bias, num_heads)
        x2d = pallas_matmul_residual(attn.reshape(B * S, D),
                                     layer["wo"], layer["bo"], x2d)
        # residual 2: x + ffn(norm(x)) — fully fused (LN + w1 + ReLU + w2 + residual),
        # the (B*S, d_ff) hidden never touches HBM.
        x2d = pallas_ffn(x2d, layer["norm2"], layer["w1"], layer["b1"],
                         layer["w2"], layer["b2"])
        # TODO(synk): dropout omitted (inference mode -> identity)

    out2d = pallas_layernorm(x2d, params["final_norm"])
    return out2d.reshape(B, S, D)


# ----------------------------- pure-JAX reference -----------------------------

def reference_forward(x, mask, params, num_heads):
    def ln(z, g):
        mean = z.mean(-1, keepdims=True)
        var = ((z - mean) ** 2).sum(-1, keepdims=True) / (z.shape[-1] - 1)
        return g[0] * (z - mean) / (jnp.sqrt(var) + EPS) + g[1]

    B, S, D = x.shape
    dh = D // num_heads
    for layer in params["layers"]:
        xn = ln(x, layer["norm1"])
        qkv = xn @ layer["wqkv"] + layer["bqkv"]
        q, k, v = jnp.split(qkv, 3, axis=-1)
        q = q.reshape(B, S, num_heads, dh).transpose(0, 2, 1, 3)
        k = k.reshape(B, S, num_heads, dh).transpose(0, 2, 1, 3)
        v = v.reshape(B, S, num_heads, dh).transpose(0, 2, 1, 3)
        s = jnp.einsum("bhqd,bhkd->bhqk", q, k) / math.sqrt(dh)
        s = jnp.where(mask == 0, -1e9, s)
        p = jax.nn.softmax(s, axis=-1)
        o = jnp.einsum("bhqk,bhkd->bhqd", p, v).transpose(0, 2, 1, 3).reshape(B, S, D)
        x = x + o @ layer["wo"] + layer["bo"]
        xn = ln(x, layer["norm2"])
        h = jax.nn.relu(xn @ layer["w1"] + layer["b1"])
        x = x + h @ layer["w2"] + layer["b2"]
    return ln(x, params["final_norm"])


# ----------------------------- deterministic init ----------------------------

def init_params(key, num_layers, d_model, d_ff):
    def lin(k, din, dout):
        w = jax.random.normal(k, (din, dout), jnp.float32) * 0.02
        return w, jnp.zeros((dout,), jnp.float32)

    def norm():
        return jnp.array([1.0, 0.0], jnp.float32)   # [alpha, bias]

    layers = []
    for l in range(num_layers):
        ks = jax.random.split(jax.random.fold_in(key, l), 6)
        wq, bq = lin(ks[0], d_model, d_model)
        wk, bk = lin(ks[1], d_model, d_model)
        wv, bv = lin(ks[2], d_model, d_model)
        wo, bo = lin(ks[3], d_model, d_model)
        w1, b1 = lin(ks[4], d_model, d_ff)
        w2, b2 = lin(ks[5], d_ff, d_model)
        layers.append({
            "norm1": norm(), "norm2": norm(),
            "wqkv": jnp.concatenate([wq, wk, wv], axis=1),   # (D, 3D)
            "bqkv": jnp.concatenate([bq, bk, bv], axis=0),   # (3D,)
            "wo": wo, "bo": bo, "w1": w1, "b1": b1, "w2": w2, "b2": b2,
        })
    return {"layers": layers, "final_norm": norm()}


def to_kernel_params(params):
    """bf16 copies of the weight matrices (biases / norm scalars stay f32)."""
    def cvt(layer):
        out = dict(layer)
        for name in ("wqkv", "wo", "w1", "w2"):
            out[name] = layer[name].astype(jnp.bfloat16)
        return out
    return {"layers": [cvt(l) for l in params["layers"]],
            "final_norm": params["final_norm"]}


# ----------------------------- main -------------------------------------------

if __name__ == "__main__":
    base_key = jax.random.PRNGKey(0)

    def run_case(name, B, S, D, H, DFF, L, salt):
        key = jax.random.fold_in(base_key, salt)
        kx, kp = jax.random.split(key)
        x = jax.random.normal(kx, (B, S, D), jnp.float32)

        # mask (B, 1, 1, S): last batch element has 3 padded positions
        lens = jnp.full((B,), S).at[-1].set(S - 3)
        mask = (jnp.arange(S)[None, :] < lens[:, None]).astype(jnp.float32)
        mask = mask.reshape(B, 1, 1, S)

        params = init_params(kp, L, D, DFF)
        kparams = to_kernel_params(params)

        fwd = jax.jit(functools.partial(encoder_forward, num_heads=H))
        out = jax.block_until_ready(fwd(x, mask, kparams))

        ref = reference_forward(x, mask, params, H)
        assert out.shape == (B, S, D)
        assert bool(jnp.all(jnp.isfinite(out)))
        err = float(jnp.max(jnp.abs(out - ref)))
        assert bool(jnp.allclose(out, ref, atol=3e-2, rtol=3e-2)), (name, err)
        return err

    # Config A: small heads (dh=8) -> exercises the all-heads-per-step attention path.
    run_case("small", B=2, S=8, D=32, H=4, DFF=64, L=2, salt=0)
    # Config B: dh=128 -> exercises the lane-dense head-parallel attention path.
    run_case("headpar", B=2, S=8, D=256, H=2, DFF=512, L=2, salt=1)

    print("KERNEL_OK")
</pallas_src>

<mosaic_0001>
module attributes {stable_mosaic.version = 11 : i64} {
  func.func @matmul_residual_k1_kernel(%arg0: i32, %arg1: i32, %arg2: memref<16x32xbf16, #tpu.memory_space<vmem>>, %arg3: memref<32x32xbf16, #tpu.memory_space<vmem>>, %arg4: memref<1x32xf32, #tpu.memory_space<vmem>>, %arg5: memref<16x32xf32, #tpu.memory_space<vmem>>, %arg6: memref<16x32xf32, #tpu.memory_space<vmem>>) attributes {dimension_semantics = [#tpu.dimension_semantics<parallel>, #tpu.dimension_semantics<parallel>], iteration_bounds = array<i64: 1, 1>, scalar_prefetch = 0 : i64, scratch_operands = 0 : i64, tpu.core_type = #tpu.core_type<tc>, window_params = [{transform_indices = @transform_0, window_bounds = array<i64: 16, 32>}, {transform_indices = @transform_1, window_bounds = array<i64: 32, 32>}, {transform_indices = @transform_2, window_bounds = array<i64: 1, 32>}, {transform_indices = @transform_3, window_bounds = array<i64: 16, 32>}, {transform_indices = @transform_4, window_bounds = array<i64: 16, 32>}]} {
    %c0 = arith.constant 0 : index
    %c0_0 = arith.constant 0 : index
    %0 = vector.load %arg2[%c0, %c0_0] : memref<16x32xbf16, #tpu.memory_space<vmem>>, vector<16x32xbf16>
    %c0_1 = arith.constant 0 : index
    %c0_2 = arith.constant 0 : index
    %1 = vector.load %arg3[%c0_1, %c0_2] : memref<32x32xbf16, #tpu.memory_space<vmem>>, vector<32x32xbf16>
    %cst = arith.constant dense<0.000000e+00> : vector<16x32xf32>
    %2 = tpu.matmul %0, %1, %cst {dimension_numbers = #tpu.dot_dimension_numbers<[1], [0], [0], [1], [0, 0, 1, 1], [], []>} : vector<16x32xbf16>, vector<32x32xbf16>, vector<16x32xf32> -> vector<16x32xf32>
    %c0_3 = arith.constant 0 : index
    %c0_4 = arith.constant 0 : index
    %3 = vector.load %arg4[%c0_3, %c0_4] : memref<1x32xf32, #tpu.memory_space<vmem>>, vector<1x32xf32>
    %4 = vector.broadcast %3 : vector<1x32xf32> to vector<16x32xf32>
    %5 = arith.addf %2, %4 : vector<16x32xf32>
    %c0_5 = arith.constant 0 : index
    %c0_6 = arith.constant 0 : index
    %6 = vector.load %arg5[%c0_5, %c0_6] : memref<16x32xf32, #tpu.memory_space<vmem>>, vector<16x32xf32>
    %7 = arith.addf %5, %6 : vector<16x32xf32>
    %c0_7 = arith.constant 0 : index
    %c0_8 = arith.constant 0 : index
    %8 = vector.load %arg6[%c0_7, %c0_8] : memref<16x32xf32, #tpu.memory_space<vmem>>, vector<16x32xf32>
    tpu.vector_store %arg6[%c0_7, %c0_8], %7 {strides = array<i32>} : memref<16x32xf32, #tpu.memory_space<vmem>>, vector<16x32xf32>,
    return
  }
  func.func @transform_0(%arg0: i32, %arg1: i32) -> (i32, i32) {
    %c0_i32 = arith.constant 0 : i32
    %c0_i32_0 = arith.constant 0 : i32
    return %arg0, %c0_i32 : i32, i32
  }
  func.func @transform_1(%arg0: i32, %arg1: i32) -> (i32, i32) {
    %c0_i32 = arith.constant 0 : i32
    %c0_i32_0 = arith.constant 0 : i32
    return %c0_i32, %arg1 : i32, i32
  }
  func.func @transform_2(%arg0: i32, %arg1: i32) -> (i32, i32) {
    %c0_i32 = arith.constant 0 : i32
    %c0_i32_0 = arith.constant 0 : i32
    return %c0_i32, %arg1 : i32, i32
  }
  func.func @transform_3(%arg0: i32, %arg1: i32) -> (i32, i32) {
    %c0_i32 = arith.constant 0 : i32
    return %arg0, %arg1 : i32, i32
  }
  func.func @transform_4(%arg0: i32, %arg1: i32) -> (i32, i32) {
    %c0_i32 = arith.constant 0 : i32
    return %arg0, %arg1 : i32, i32
  }
}

module attributes {stable_mosaic.version = 11 : i64} {
  func.func @ln_matmul_kernel(%arg0: i32, %arg1: i32, %arg2: memref<16x32xf32, #tpu.memory_space<vmem>>, %arg3: memref<32x96xbf16, #tpu.memory_space<vmem>>, %arg4: memref<1x96xf32, #tpu.memory_space<vmem>>, %arg5: memref<2xf32, #tpu.memory_space<smem>>, %arg6: memref<16x96xbf16, #tpu.memory_space<vmem>>, %arg7: memref<16x32xbf16, #tpu.memory_space<vmem>>) attributes {dimension_semantics = [#tpu.dimension_semantics<parallel>, #tpu.dimension_semantics<arbitrary>], iteration_bounds = array<i64: 1, 1>, scalar_prefetch = 0 : i64, scratch_operands = 1 : i64, tpu.core_type = #tpu.core_type<tc>, window_params = [{transform_indices = @transform_0, window_bounds = array<i64: 16, 32>}, {transform_indices = @transform_1, window_bounds = array<i64: 32, 96>}, {transform_indices = @transform_2, window_bounds = array<i64: 1, 96>}, {transform_indices = @transform_3, window_bounds = array<i64: 2>}, {transform_indices = @transform_4, window_bounds = array<i64: 16, 96>}]} {
    %c0_i32 = arith.constant 0 : i32
    %0 = arith.cmpi eq, %arg1, %c0_i32 : i32
    %1 = arith.extui %0 : i1 to i32
    %c0_i32_0 = arith.constant 0 : i32
    %2 = arith.cmpi ne, %1, %c0_i32_0 : i32
    scf.if %2 {
      %c0_8 = arith.constant 0 : index
      %c0_9 = arith.constant 0 : index
      %11 = vector.load %arg2[%c0_8, %c0_9] : memref<16x32xf32, #tpu.memory_space<vmem>>, vector<16x32xf32>
      %cst_10 = arith.constant dense<0.000000e+00> : vector<16xf32>
      %12 = vector.multi_reduction <add>, %11, %cst_10 [1] : vector<16x32xf32> to vector<16xf32>
      %13 = vector.shape_cast %12 : vector<16xf32> to vector<16x1xf32>
      %cst_11 = arith.constant 3.200000e+01 : f32
      %14 = vector.broadcast %cst_11 : f32 to vector<16x1xf32>
      %15 = arith.divf %13, %14 : vector<16x1xf32>
      %16 = vector.broadcast %15 : vector<16x1xf32> to vector<16x32xf32>
      %17 = arith.subf %11, %16 : vector<16x32xf32>
      %18 = arith.mulf %17, %17 : vector<16x32xf32>
      %cst_12 = arith.constant dense<0.000000e+00> : vector<16xf32>
      %19 = vector.multi_reduction <add>, %18, %cst_12 [1] : vector<16x32xf32> to vector<16xf32>
      %20 = vector.shape_cast %19 : vector<16xf32> to vector<16x1xf32>
      %cst_13 = arith.constant 3.100000e+01 : f32
      %21 = vector.broadcast %cst_13 : f32 to vector<16x1xf32>
      %22 = arith.divf %20, %21 : vector<16x1xf32>
      %23 = math.sqrt %22 : vector<16x1xf32>
      %cst_14 = arith.constant 9.99999997E-7 : f32
      %24 = vector.broadcast %cst_14 : f32 to vector<16x1xf32>
      %25 = arith.addf %23, %24 : vector<16x1xf32>
      %cst_15 = arith.constant 1.000000e+00 : f32
      %26 = vector.broadcast %cst_15 : f32 to vector<16x1xf32>
      %27 = arith.divf %26, %25 : vector<16x1xf32>
      %c0_16 = arith.constant 0 : index
      %28 = memref.load %arg5[%c0_16] : memref<2xf32, #tpu.memory_space<smem>>
      %29 = vector.broadcast %15 : vector<16x1xf32> to vector<16x32xf32>
      %30 = arith.subf %11, %29 : vector<16x32xf32>
      %31 = vector.broadcast %28 : f32 to vector<16x32xf32>
      %32 = arith.mulf %31, %30 : vector<16x32xf32>
      %33 = vector.broadcast %27 : vector<16x1xf32> to vector<16x32xf32>
      %34 = arith.mulf %32, %33 : vector<16x32xf32>
      %c1 = arith.constant 1 : index
      %35 = memref.load %arg5[%c1] : memref<2xf32, #tpu.memory_space<smem>>
      %36 = vector.broadcast %35 : f32 to vector<16x32xf32>
      %37 = arith.addf %34, %36 : vector<16x32xf32>
      %38 = arith.truncf %37 : vector<16x32xf32> to vector<16x32xbf16>
      %c0_17 = arith.constant 0 : index
      %c0_18 = arith.constant 0 : index
      %39 = vector.load %arg7[%c0_17, %c0_18] : memref<16x32xbf16, #tpu.memory_space<vmem>>, vector<16x32xbf16>
      tpu.vector_store %arg7[%c0_17, %c0_18], %38 {strides = array<i32>} : memref<16x32xbf16, #tpu.memory_space<vmem>>, vector<16x32xbf16>,
    } else {
    }
    %c0 = arith.constant 0 : index
    %c0_1 = arith.constant 0 : index
    %3 = vector.load %arg7[%c0, %c0_1] : memref<16x32xbf16, #tpu.memory_space<vmem>>, vector<16x32xbf16>
    %c0_2 = arith.constant 0 : index
    %c0_3 = arith.constant 0 : index
    %4 = vector.load %arg3[%c0_2, %c0_3] : memref<32x96xbf16, #tpu.memory_space<vmem>>, vector<32x96xbf16>
    %cst = arith.constant dense<0.000000e+00> : vector<16x96xf32>
    %5 = tpu.matmul %3, %4, %cst {dimension_numbers = #tpu.dot_dimension_numbers<[1], [0], [0], [1], [0, 0, 1, 1], [], []>} : vector<16x32xbf16>, vector<32x96xbf16>, vector<16x96xf32> -> vector<16x96xf32>
    %c0_4 = arith.constant 0 : index
    %c0_5 = arith.constant 0 : index
    %6 = vector.load %arg4[%c0_4, %c0_5] : memref<1x96xf32, #tpu.memory_space<vmem>>, vector<1x96xf32>
    %7 = vector.broadcast %6 : vector<1x96xf32> to vector<16x96xf32>
    %8 = arith.addf %5, %7 : vector<16x96xf32>
    %9 = arith.truncf %8 : vector<16x96xf32> to vector<16x96xbf16>
    %c0_6 = arith.constant 0 : index
    %c0_7 = arith.constant 0 : index
    %10 = vector.load %arg6[%c0_6, %c0_7] : memref<16x96xbf16, #tpu.memory_space<vmem>>, vector<16x96xbf16>
    tpu.vector_store %arg6[%c0_6, %c0_7], %9 {strides = array<i32>} : memref<16x96xbf16, #tpu.memory_space<vmem>>, vector<16x96xbf16>,
    return
  }
  func.func @transform_0(%arg0: i32, %arg1: i32) -> (i32, i32) {
    %c0_i32 = arith.constant 0 : i32
    %c0_i32_0 = arith.constant 0 : i32
    return %arg0, %c0_i32 : i32, i32
  }
  func.func @transform_1(%arg0: i32, %arg1: i32) -> (i32, i32) {
    %c0_i32 = arith.constant 0 : i32
    %c0_i32_0 = arith.constant 0 : i32
    return %c0_i32, %arg1 : i32, i32
  }
  func.func @transform_2(%arg0: i32, %arg1: i32) -> (i32, i32) {
    %c0_i32 = arith.constant 0 : i32
    %c0_i32_0 = arith.constant 0 : i32
    return %c0_i32, %arg1 : i32, i32
  }
  func.func @transform_3(%arg0: i32, %arg1: i32) -> i32 {
    %c0_i32 = arith.constant 0 : i32
    %c0_i32_0 = arith.constant 0 : i32
    return %c0_i32 : i32
  }
  func.func @transform_4(%arg0: i32, %arg1: i32) -> (i32, i32) {
    %c0_i32 = arith.constant 0 : i32
    return %arg0, %arg1 : i32, i32
  }
}

module attributes {stable_mosaic.version = 11 : i64} {
  func.func @attn_batch_kernel(%arg0: i32, %arg1: memref<1x8x96xbf16, #tpu.memory_space<vmem>>, %arg2: memref<1x1x8xf32, #tpu.memory_space<vmem>>, %arg3: memref<1x8x32xbf16, #tpu.memory_space<vmem>>) attributes {dimension_semantics = [#tpu.dimension_semantics<parallel>], iteration_bounds = array<i64: 2>, scalar_prefetch = 0 : i64, scratch_operands = 0 : i64, tpu.core_type = #tpu.core_type<tc>, window_params = [{transform_indices = @transform_0, window_bounds = array<i64: 1, 8, 96>}, {transform_indices = @transform_1, window_bounds = array<i64: 1, 1, 8>}, {transform_indices = @transform_2, window_bounds = array<i64: 1, 8, 32>}]} {
    %c0 = arith.constant 0 : index
    %c0_0 = arith.constant 0 : index
    %c0_1 = arith.constant 0 : index
    %0 = vector.load %arg1[%c0, %c0_0, %c0_1] : memref<1x8x96xbf16, #tpu.memory_space<vmem>>, vector<1x8x96xbf16>
    %1 = vector.shape_cast %0 : vector<1x8x96xbf16> to vector<8x96xbf16>
    %c0_2 = arith.constant 0 : index
    %c0_3 = arith.constant 0 : index
    %c0_4 = arith.constant 0 : index
    %2 = vector.load %arg2[%c0_2, %c0_3, %c0_4] : memref<1x1x8xf32, #tpu.memory_space<vmem>>, vector<1x1x8xf32>
    %3 = vector.shape_cast %2 : vector<1x1x8xf32> to vector<1x8xf32>
    %4 = vector.extract_strided_slice %1 {offsets = [0, 0], sizes = [8, 8], strides = [1, 1]} : vector<8x96xbf16> to vector<8x8xbf16>
    %cst = arith.constant 3.535160e-01 : bf16
    %5 = vector.broadcast %cst : bf16 to vector<8x8xbf16>
    %6 = arith.mulf %4, %5 : vector<8x8xbf16>
    %7 = vector.extract_strided_slice %1 {offsets = [0, 32], sizes = [8, 8], strides = [1, 1]} : vector<8x96xbf16> to vector<8x8xbf16>
    %8 = vector.extract_strided_slice %1 {offsets = [0, 64], sizes = [8, 8], strides = [1, 1]} : vector<8x96xbf16> to vector<8x8xbf16>
    %cst_5 = arith.constant dense<0.000000e+00> : vector<8x8xf32>
    %9 = tpu.matmul %6, %7, %cst_5 {dimension_numbers = #tpu.dot_dimension_numbers<[1], [1], [0], [0], [0, 0, 1, 0], [], []>} : vector<8x8xbf16>, vector<8x8xbf16>, vector<8x8xf32> -> vector<8x8xf32>
    %10 = vector.broadcast %3 : vector<1x8xf32> to vector<8x8xf32>
    %11 = arith.addf %9, %10 : vector<8x8xf32>
    %cst_6 = arith.constant dense<0xFF800000> : vector<8xf32>
    %12 = vector.multi_reduction <maximumf>, %11, %cst_6 [1] : vector<8x8xf32> to vector<8xf32>
    %13 = vector.shape_cast %12 : vector<8xf32> to vector<8x1xf32>
    %14 = vector.broadcast %13 : vector<8x1xf32> to vector<8x8xf32>
    %15 = arith.subf %11, %14 : vector<8x8xf32>
    %16 = math.exp %15 : vector<8x8xf32>
    %cst_7 = arith.constant dense<0.000000e+00> : vector<8xf32>
    %17 = vector.multi_reduction <add>, %16, %cst_7 [1] : vector<8x8xf32> to vector<8xf32>
    %18 = vector.shape_cast %17 : vector<8xf32> to vector<8x1xf32>
    %19 = tpu.reciprocal %18 {approx = true} : vector<8x1xf32> -> vector<8x1xf32>
    %20 = vector.broadcast %19 : vector<8x1xf32> to vector<8x8xf32>
    %21 = arith.mulf %16, %20 : vector<8x8xf32>
    %22 = arith.truncf %21 : vector<8x8xf32> to vector<8x8xbf16>
    %cst_8 = arith.constant dense<0.000000e+00> : vector<8x8xf32>
    %23 = tpu.matmul %22, %8, %cst_8 {dimension_numbers = #tpu.dot_dimension_numbers<[1], [0], [0], [1], [0, 0, 1, 1], [], []>} : vector<8x8xbf16>, vector<8x8xbf16>, vector<8x8xf32> -> vector<8x8xf32>
    %24 = arith.truncf %23 : vector<8x8xf32> to vector<8x8xbf16>
    %c0_9 = arith.constant 0 : index
    %c0_10 = arith.constant 0 : index
    %c0_11 = arith.constant 0 : index
    %25 = vector.load %arg3[%c0_9, %c0_10, %c0_11] : memref<1x8x32xbf16, #tpu.memory_space<vmem>>, vector<1x8x8xbf16>
    %26 = vector.shape_cast %25 : vector<1x8x8xbf16> to vector<8x8xbf16>
    %27 = vector.shape_cast %24 : vector<8x8xbf16> to vector<1x8x8xbf16>
    tpu.vector_store %arg3[%c0_9, %c0_10, %c0_11], %27 {strides = array<i32>} : memref<1x8x32xbf16, #tpu.memory_space<vmem>>, vector<1x8x8xbf16>,
    %28 = vector.extract_strided_slice %1 {offsets = [0, 8], sizes = [8, 8], strides = [1, 1]} : vector<8x96xbf16> to vector<8x8xbf16>
    %cst_12 = arith.constant 3.535160e-01 : bf16
    %29 = vector.broadcast %cst_12 : bf16 to vector<8x8xbf16>
    %30 = arith.mulf %28, %29 : vector<8x8xbf16>
    %31 = vector.extract_strided_slice %1 {offsets = [0, 40], sizes = [8, 8], strides = [1, 1]} : vector<8x96xbf16> to vector<8x8xbf16>
    %32 = vector.extract_strided_slice %1 {offsets = [0, 72], sizes = [8, 8], strides = [1, 1]} : vector<8x96xbf16> to vector<8x8xbf16>
    %cst_13 = arith.constant dense<0.000000e+00> : vector<8x8xf32>
    %33 = tpu.matmul %30, %31, %cst_13 {dimension_numbers = #tpu.dot_dimension_numbers<[1], [1], [0], [0], [0, 0, 1, 0], [], []>} : vector<8x8xbf16>, vector<8x8xbf16>, vector<8x8xf32> -> vector<8x8xf32>
    %34 = vector.broadcast %3 : vector<1x8xf32> to vector<8x8xf32>
    %35 = arith.addf %33, %34 : vector<8x8xf32>
    %cst_14 = arith.constant dense<0xFF800000> : vector<8xf32>
    %36 = vector.multi_reduction <maximumf>, %35, %cst_14 [1] : vector<8x8xf32> to vector<8xf32>
    %37 = vector.shape_cast %36 : vector<8xf32> to vector<8x1xf32>
    %38 = vector.broadcast %37 : vector<8x1xf32> to vector<8x8xf32>
    %39 = arith.subf %35, %38 : vector<8x8xf32>
    %40 = math.exp %39 : vector<8x8xf32>
    %cst_15 = arith.constant dense<0.000000e+00> : vector<8xf32>
    %41 = vector.multi_reduction <add>, %40, %cst_15 [1] : vector<8x8xf32> to vector<8xf32>
    %42 = vector.shape_cast %41 : vector<8xf32> to vector<8x1xf32>
    %43 = tpu.reciprocal %42 {approx = true} : vector<8x1xf32> -> vector<8x1xf32>
    %44 = vector.broadcast %43 : vector<8x1xf32> to vector<8x8xf32>
    %45 = arith.mulf %40, %44 : vector<8x8xf32>
    %46 = arith.truncf %45 : vector<8x8xf32> to vector<8x8xbf16>
    %cst_16 = arith.constant dense<0.000000e+00> : vector<8x8xf32>
    %47 = tpu.matmul %46, %32, %cst_16 {dimension_numbers = #tpu.dot_dimension_numbers<[1], [0], [0], [1], [0, 0, 1, 1], [], []>} : vector<8x8xbf16>, vector<8x8xbf16>, vector<8x8xf32> -> vector<8x8xf32>
    %48 = arith.truncf %47 : vector<8x8xf32> to vector<8x8xbf16>
    %c0_17 = arith.constant 0 : index
    %c0_18 = arith.constant 0 : index
    %c8 = arith.constant 8 : index
    %49 = vector.load %arg3[%c0_17, %c0_18, %c8] : memref<1x8x32xbf16, #tpu.memory_space<vmem>>, vector<1x8x8xbf16>
    %50 = vector.shape_cast %49 : vector<1x8x8xbf16> to vector<8x8xbf16>
    %51 = vector.shape_cast %48 : vector<8x8xbf16> to vector<1x8x8xbf16>
    tpu.vector_store %arg3[%c0_17, %c0_18, %c8], %51 {strides = array<i32>} : memref<1x8x32xbf16, #tpu.memory_space<vmem>>, vector<1x8x8xbf16>,
    %52 = vector.extract_strided_slice %1 {offsets = [0, 16], sizes = [8, 8], strides = [1, 1]} : vector<8x96xbf16> to vector<8x8xbf16>
    %cst_19 = arith.constant 3.535160e-01 : bf16
    %53 = vector.broadcast %cst_19 : bf16 to vector<8x8xbf16>
    %54 = arith.mulf %52, %53 : vector<8x8xbf16>
    %55 = vector.extract_strided_slice %1 {offsets = [0, 48], sizes = [8, 8], strides = [1, 1]} : vector<8x96xbf16> to vector<8x8xbf16>
    %56 = vector.extract_strided_slice %1 {offsets = [0, 80], sizes = [8, 8], strides = [1, 1]} : vector<8x96xbf16> to vector<8x8xbf16>
    %cst_20 = arith.constant dense<0.000000e+00> : vector<8x8xf32>
    %57 = tpu.matmul %54, %55, %cst_20 {dimension_numbers = #tpu.dot_dimension_numbers<[1], [1], [0], [0], [0, 0, 1, 0], [], []>} : vector<8x8xbf16>, vector<8x8xbf16>, vector<8x8xf32> -> vector<8x8xf32>
    %58 = vector.broadcast %3 : vector<1x8xf32> to vector<8x8xf32>
    %59 = arith.addf %57, %58 : vector<8x8xf32>
    %cst_21 = arith.constant dense<0xFF800000> : vector<8xf32>
    %60 = vector.multi_reduction <maximumf>, %59, %cst_21 [1] : vector<8x8xf32> to vector<8xf32>
    %61 = vector.shape_cast %60 : vector<8xf32> to vector<8x1xf32>
    %62 = vector.broadcast %61 : vector<8x1xf32> to vector<8x8xf32>
    %63 = arith.subf %59, %62 : vector<8x8xf32>
    %64 = math.exp %63 : vector<8x8xf32>
    %cst_22 = arith.constant dense<0.000000e+00> : vector<8xf32>
    %65 = vector.multi_reduction <add>, %64, %cst_22 [1] : vector<8x8xf32> to vector<8xf32>
    %66 = vector.shape_cast %65 : vector<8xf32> to vector<8x1xf32>
    %67 = tpu.reciprocal %66 {approx = true} : vector<8x1xf32> -> vector<8x1xf32>
    %68 = vector.broadcast %67 : vector<8x1xf32> to vector<8x8xf32>
    %69 = arith.mulf %64, %68 : vector<8x8xf32>
    %70 = arith.truncf %69 : vector<8x8xf32> to vector<8x8xbf16>
    %cst_23 = arith.constant dense<0.000000e+00> : vector<8x8xf32>
    %71 = tpu.matmul %70, %56, %cst_23 {dimension_numbers = #tpu.dot_dimension_numbers<[1], [0], [0], [1], [0, 0, 1, 1], [], []>} : vector<8x8xbf16>, vector<8x8xbf16>, vector<8x8xf32> -> vector<8x8xf32>
    %72 = arith.truncf %71 : vector<8x8xf32> to vector<8x8xbf16>
    %c0_24 = arith.constant 0 : index
    %c0_25 = arith.constant 0 : index
    %c16 = arith.constant 16 : index
    %73 = vector.load %arg3[%c0_24, %c0_25, %c16] : memref<1x8x32xbf16, #tpu.memory_space<vmem>>, vector<1x8x8xbf16>
    %74 = vector.shape_cast %73 : vector<1x8x8xbf16> to vector<8x8xbf16>
    %75 = vector.shape_cast %72 : vector<8x8xbf16> to vector<1x8x8xbf16>
    tpu.vector_store %arg3[%c0_24, %c0_25, %c16], %75 {strides = array<i32>} : memref<1x8x32xbf16, #tpu.memory_space<vmem>>, vector<1x8x8xbf16>,
    %76 = vector.extract_strided_slice %1 {offsets = [0, 24], sizes = [8, 8], strides = [1, 1]} : vector<8x96xbf16> to vector<8x8xbf16>
    %cst_26 = arith.constant 3.535160e-01 : bf16
    %77 = vector.broadcast %cst_26 : bf16 to vector<8x8xbf16>
    %78 = arith.mulf %76, %77 : vector<8x8xbf16>
    %79 = vector.extract_strided_slice %1 {offsets = [0, 56], sizes = [8, 8], strides = [1, 1]} : vector<8x96xbf16> to vector<8x8xbf16>
    %80 = vector.extract_strided_slice %1 {offsets = [0, 88], sizes = [8, 8], strides = [1, 1]} : vector<8x96xbf16> to vector<8x8xbf16>
    %cst_27 = arith.constant dense<0.000000e+00> : vector<8x8xf32>
    %81 = tpu.matmul %78, %79, %cst_27 {dimension_numbers = #tpu.dot_dimension_numbers<[1], [1], [0], [0], [0, 0, 1, 0], [], []>} : vector<8x8xbf16>, vector<8x8xbf16>, vector<8x8xf32> -> vector<8x8xf32>
    %82 = vector.broadcast %3 : vector<1x8xf32> to vector<8x8xf32>
    %83 = arith.addf %81, %82 : vector<8x8xf32>
    %cst_28 = arith.constant dense<0xFF800000> : vector<8xf32>
    %84 = vector.multi_reduction <maximumf>, %83, %cst_28 [1] : vector<8x8xf32> to vector<8xf32>
    %85 = vector.shape_cast %84 : vector<8xf32> to vector<8x1xf32>
    %86 = vector.broadcast %85 : vector<8x1xf32> to vector<8x8xf32>
    %87 = arith.subf %83, %86 : vector<8x8xf32>
    %88 = math.exp %87 : vector<8x8xf32>
    %cst_29 = arith.constant dense<0.000000e+00> : vector<8xf32>
    %89 = vector.multi_reduction <add>, %88, %cst_29 [1] : vector<8x8xf32> to vector<8xf32>
    %90 = vector.shape_cast %89 : vector<8xf32> to vector<8x1xf32>
    %91 = tpu.reciprocal %90 {approx = true} : vector<8x1xf32> -> vector<8x1xf32>
    %92 = vector.broadcast %91 : vector<8x1xf32> to vector<8x8xf32>
    %93 = arith.mulf %88, %92 : vector<8x8xf32>
    %94 = arith.truncf %93 : vector<8x8xf32> to vector<8x8xbf16>
    %cst_30 = arith.constant dense<0.000000e+00> : vector<8x8xf32>
    %95 = tpu.matmul %94, %80, %cst_30 {dimension_numbers = #tpu.dot_dimension_numbers<[1], [0], [0], [1], [0, 0, 1, 1], [], []>} : vector<8x8xbf16>, vector<8x8xbf16>, vector<8x8xf32> -> vector<8x8xf32>
    %96 = arith.truncf %95 : vector<8x8xf32> to vector<8x8xbf16>
    %c0_31 = arith.constant 0 : index
    %c0_32 = arith.constant 0 : index
    %c24 = arith.constant 24 : index
    %97 = vector.load %arg3[%c0_31, %c0_32, %c24] : memref<1x8x32xbf16, #tpu.memory_space<vmem>>, vector<1x8x8xbf16>
    %98 = vector.shape_cast %97 : vector<1x8x8xbf16> to vector<8x8xbf16>
    %99 = vector.shape_cast %96 : vector<8x8xbf16> to vector<1x8x8xbf16>
    tpu.vector_store %arg3[%c0_31, %c0_32, %c24], %99 {strides = array<i32>} : memref<1x8x32xbf16, #tpu.memory_space<vmem>>, vector<1x8x8xbf16>,
    return
  }
  func.func @transform_0(%arg0: i32) -> (i32, i32, i32) {
    %c0_i32 = arith.constant 0 : i32
    %c0_i32_0 = arith.constant 0 : i32
    %c0_i32_1 = arith.constant 0 : i32
    return %arg0, %c0_i32, %c0_i32_0 : i32, i32, i32
  }
  func.func @transform_1(%arg0: i32) -> (i32, i32, i32) {
    %c0_i32 = arith.constant 0 : i32
    %c0_i32_0 = arith.constant 0 : i32
    %c0_i32_1 = arith.constant 0 : i32
    return %arg0, %c0_i32, %c0_i32_0 : i32, i32, i32
  }
  func.func @transform_2(%arg0: i32) -> (i32, i32, i32) {
    %c0_i32 = arith.constant 0 : i32
    %c0_i32_0 = arith.constant 0 : i32
    %c0_i32_1 = arith.constant 0 : i32
    return %arg0, %c0_i32, %c0_i32_0 : i32, i32, i32
  }
}

module attributes {stable_mosaic.version = 11 : i64} {
  func.func @ffn_kernel(%arg0: i32, %arg1: i32, %arg2: memref<16x32xf32, #tpu.memory_space<vmem>>, %arg3: memref<32x64xbf16, #tpu.memory_space<vmem>>, %arg4: memref<1x64xf32, #tpu.memory_space<vmem>>, %arg5: memref<64x32xbf16, #tpu.memory_space<vmem>>, %arg6: memref<1x32xf32, #tpu.memory_space<vmem>>, %arg7: memref<2xf32, #tpu.memory_space<smem>>, %arg8: memref<16x32xf32, #tpu.memory_space<vmem>>, %arg9: memref<16x32xf32, #tpu.memory_space<vmem>>, %arg10: memref<16x32xbf16, #tpu.memory_space<vmem>>) attributes {dimension_semantics = [#tpu.dimension_semantics<parallel>, #tpu.dimension_semantics<arbitrary>], iteration_bounds = array<i64: 1, 1>, scalar_prefetch = 0 : i64, scratch_operands = 2 : i64, tpu.core_type = #tpu.core_type<tc>, window_params = [{transform_indices = @transform_0, window_bounds = array<i64: 16, 32>}, {transform_indices = @transform_1, window_bounds = array<i64: 32, 64>}, {transform_indices = @transform_2, window_bounds = array<i64: 1, 64>}, {transform_indices = @transform_3, window_bounds = array<i64: 64, 32>}, {pipeline_mode = #tpu.pipeline_mode<synchronous>, transform_indices = @transform_4, window_bounds = array<i64: 1, 32>}, {transform_indices = @transform_5, window_bounds = array<i64: 2>}, {transform_indices = @transform_6, window_bounds = array<i64: 16, 32>}]} {
    %c0_i32 = arith.constant 0 : i32
    %0 = arith.cmpi eq, %arg1, %c0_i32 : i32
    %1 = arith.extui %0 : i1 to i32
    %c0_i32_0 = arith.constant 0 : i32
    %2 = arith.cmpi ne, %1, %c0_i32_0 : i32
    scf.if %2 {
      %c0_16 = arith.constant 0 : index
      %c0_17 = arith.constant 0 : index
      %20 = vector.load %arg2[%c0_16, %c0_17] : memref<16x32xf32, #tpu.memory_space<vmem>>, vector<16x32xf32>
      %cst_18 = arith.constant dense<0.000000e+00> : vector<16xf32>
      %21 = vector.multi_reduction <add>, %20, %cst_18 [1] : vector<16x32xf32> to vector<16xf32>
      %22 = vector.shape_cast %21 : vector<16xf32> to vector<16x1xf32>
      %cst_19 = arith.constant 3.200000e+01 : f32
      %23 = vector.broadcast %cst_19 : f32 to vector<16x1xf32>
      %24 = arith.divf %22, %23 : vector<16x1xf32>
      %25 = vector.broadcast %24 : vector<16x1xf32> to vector<16x32xf32>
      %26 = arith.subf %20, %25 : vector<16x32xf32>
      %27 = arith.mulf %26, %26 : vector<16x32xf32>
      %cst_20 = arith.constant dense<0.000000e+00> : vector<16xf32>
      %28 = vector.multi_reduction <add>, %27, %cst_20 [1] : vector<16x32xf32> to vector<16xf32>
      %29 = vector.shape_cast %28 : vector<16xf32> to vector<16x1xf32>
      %cst_21 = arith.constant 3.100000e+01 : f32
      %30 = vector.broadcast %cst_21 : f32 to vector<16x1xf32>
      %31 = arith.divf %29, %30 : vector<16x1xf32>
      %32 = math.sqrt %31 : vector<16x1xf32>
      %cst_22 = arith.constant 9.99999997E-7 : f32
      %33 = vector.broadcast %cst_22 : f32 to vector<16x1xf32>
      %34 = arith.addf %32, %33 : vector<16x1xf32>
      %cst_23 = arith.constant 1.000000e+00 : f32
      %35 = vector.broadcast %cst_23 : f32 to vector<16x1xf32>
      %36 = arith.divf %35, %34 : vector<16x1xf32>
      %c0_24 = arith.constant 0 : index
      %37 = memref.load %arg7[%c0_24] : memref<2xf32, #tpu.memory_space<smem>>
      %38 = vector.broadcast %24 : vector<16x1xf32> to vector<16x32xf32>
      %39 = arith.subf %20, %38 : vector<16x32xf32>
      %40 = vector.broadcast %37 : f32 to vector<16x32xf32>
      %41 = arith.mulf %40, %39 : vector<16x32xf32>
      %42 = vector.broadcast %36 : vector<16x1xf32> to vector<16x32xf32>
      %43 = arith.mulf %41, %42 : vector<16x32xf32>
      %c1 = arith.constant 1 : index
      %44 = memref.load %arg7[%c1] : memref<2xf32, #tpu.memory_space<smem>>
      %45 = vector.broadcast %44 : f32 to vector<16x32xf32>
      %46 = arith.addf %43, %45 : vector<16x32xf32>
      %47 = arith.truncf %46 : vector<16x32xf32> to vector<16x32xbf16>
      %c0_25 = arith.constant 0 : index
      %c0_26 = arith.constant 0 : index
      %48 = vector.load %arg10[%c0_25, %c0_26] : memref<16x32xbf16, #tpu.memory_space<vmem>>, vector<16x32xbf16>
      tpu.vector_store %arg10[%c0_25, %c0_26], %47 {strides = array<i32>} : memref<16x32xbf16, #tpu.memory_space<vmem>>, vector<16x32xbf16>,
      %cst_27 = arith.constant 0.000000e+00 : f32
      %49 = vector.broadcast %cst_27 : f32 to vector<16x32xf32>
      %c0_28 = arith.constant 0 : index
      %c0_29 = arith.constant 0 : index
      %50 = vector.load %arg9[%c0_28, %c0_29] : memref<16x32xf32, #tpu.memory_space<vmem>>, vector<16x32xf32>
      tpu.vector_store %arg9[%c0_28, %c0_29], %49 {strides = array<i32>} : memref<16x32xf32, #tpu.memory_space<vmem>>, vector<16x32xf32>,
    } else {
    }
    %c0 = arith.constant 0 : index
    %c0_1 = arith.constant 0 : index
    %3 = vector.load %arg10[%c0, %c0_1] : memref<16x32xbf16, #tpu.memory_space<vmem>>, vector<16x32xbf16>
    %c0_2 = arith.constant 0 : index
    %c0_3 = arith.constant 0 : index
    %4 = vector.load %arg3[%c0_2, %c0_3] : memref<32x64xbf16, #tpu.memory_space<vmem>>, vector<32x64xbf16>
    %cst = arith.constant dense<0.000000e+00> : vector<16x64xf32>
    %5 = tpu.matmul %3, %4, %cst {dimension_numbers = #tpu.dot_dimension_numbers<[1], [0], [0], [1], [0, 0, 1, 1], [], []>} : vector<16x32xbf16>, vector<32x64xbf16>, vector<16x64xf32> -> vector<16x64xf32>
    %c0_4 = arith.constant 0 : index
    %c0_5 = arith.constant 0 : index
    %6 = vector.load %arg4[%c0_4, %c0_5] : memref<1x64xf32, #tpu.memory_space<vmem>>, vector<1x64xf32>
    %7 = vector.broadcast %6 : vector<1x64xf32> to vector<16x64xf32>
    %8 = arith.addf %5, %7 : vector<16x64xf32>
    %cst_6 = arith.constant 0.000000e+00 : f32
    %9 = vector.broadcast %cst_6 : f32 to vector<16x64xf32>
    %10 = arith.maximumf %8, %9 : vector<16x64xf32>
    %c0_7 = arith.constant 0 : index
    %c0_8 = arith.constant 0 : index
    %11 = vector.load %arg9[%c0_7, %c0_8] : memref<16x32xf32, #tpu.memory_space<vmem>>, vector<16x32xf32>
    %12 = arith.truncf %10 : vector<16x64xf32> to vector<16x64xbf16>
    %c0_9 = arith.constant 0 : index
    %c0_10 = arith.constant 0 : index
    %13 = vector.load %arg5[%c0_9, %c0_10] : memref<64x32xbf16, #tpu.memory_space<vmem>>, vector<64x32xbf16>
    %cst_11 = arith.constant dense<0.000000e+00> : vector<16x32xf32>
    %14 = tpu.matmul %12, %13, %cst_11 {dimension_numbers = #tpu.dot_dimension_numbers<[1], [0], [0], [1], [0, 0, 1, 1], [], []>} : vector<16x64xbf16>, vector<64x32xbf16>, vector<16x32xf32> -> vector<16x32xf32>
    %15 = arith.addf %11, %14 : vector<16x32xf32>
    %c0_12 = arith.constant 0 : index
    %c0_13 = arith.constant 0 : index
    %16 = vector.load %arg9[%c0_12, %c0_13] : memref<16x32xf32, #tpu.memory_space<vmem>>, vector<16x32xf32>
    tpu.vector_store %arg9[%c0_12, %c0_13], %15 {strides = array<i32>} : memref<16x32xf32, #tpu.memory_space<vmem>>, vector<16x32xf32>,
    %c0_i32_14 = arith.constant 0 : i32
    %17 = arith.cmpi eq, %arg1, %c0_i32_14 : i32
    %18 = arith.extui %17 : i1 to i32
    %c0_i32_15 = arith.constant 0 : i32
    %19 = arith.cmpi ne, %18, %c0_i32_15 : i32
    scf.if %19 {
      %c0_16 = arith.constant 0 : index
      %c0_17 = arith.constant 0 : index
      %20 = vector.load %arg9[%c0_16, %c0_17] : memref<16x32xf32, #tpu.memory_space<vmem>>, vector<16x32xf32>
      %c0_18 = arith.constant 0 : index
      %c0_19 = arith.constant 0 : index
      %21 = vector.load %arg6[%c0_18, %c0_19] : memref<1x32xf32, #tpu.memory_space<vmem>>, vector<1x32xf32>
      %22 = vector.broadcast %21 : vector<1x32xf32> to vector<16x32xf32>
      %23 = arith.addf %20, %22 : vector<16x32xf32>
      %c0_20 = arith.constant 0 : index
      %c0_21 = arith.constant 0 : index
      %24 = vector.load %arg2[%c0_20, %c0_21] : memref<16x32xf32, #tpu.memory_space<vmem>>, vector<16x32xf32>
      %25 = arith.addf %23, %24 : vector<16x32xf32>
      %c0_22 = arith.constant 0 : index
      %c0_23 = arith.constant 0 : index
      %26 = vector.load %arg8[%c0_22, %c0_23] : memref<16x32xf32, #tpu.memory_space<vmem>>, vector<16x32xf32>
      tpu.vector_store %arg8[%c0_22, %c0_23], %25 {strides = array<i32>} : memref<16x32xf32, #tpu.memory_space<vmem>>, vector<16x32xf32>,
    } else {
    }
    return
  }
  func.func @transform_0(%arg0: i32, %arg1: i32) -> (i32, i32) {
    %c0_i32 = arith.constant 0 : i32
    %c0_i32_0 = arith.constant 0 : i32
    return %arg0, %c0_i32 : i32, i32
  }
  func.func @transform_1(%arg0: i32, %arg1: i32) -> (i32, i32) {
    %c0_i32 = arith.constant 0 : i32
    %c0_i32_0 = arith.constant 0 : i32
    return %c0_i32, %arg1 : i32, i32
  }
  func.func @transform_2(%arg0: i32, %arg1: i32) -> (i32, i32) {
    %c0_i32 = arith.constant 0 : i32
    %c0_i32_0 = arith.constant 0 : i32
    return %c0_i32, %arg1 : i32, i32
  }
  func.func @transform_3(%arg0: i32, %arg1: i32) -> (i32, i32) {
    %c0_i32 = arith.constant 0 : i32
    %c0_i32_0 = arith.constant 0 : i32
    return %arg1, %c0_i32 : i32, i32
  }
  func.func @transform_4(%arg0: i32, %arg1: i32) -> (i32, i32) {
    %c0_i32 = arith.constant 0 : i32
    %c0_i32_0 = arith.constant 0 : i32
    %c0_i32_1 = arith.constant 0 : i32
    return %c0_i32, %c0_i32_0 : i32, i32
  }
  func.func @transform_5(%arg0: i32, %arg1: i32) -> i32 {
    %c0_i32 = arith.constant 0 : i32
    %c0_i32_0 = arith.constant 0 : i32
    return %c0_i32 : i32
  }
  func.func @transform_6(%arg0: i32, %arg1: i32) -> (i32, i32) {
    %c0_i32 = arith.constant 0 : i32
    %c0_i32_0 = arith.constant 0 : i32
    return %arg0, %c0_i32 : i32, i32
  }
}

module attributes {stable_mosaic.version = 11 : i64} {
  func.func @ln_matmul_kernel(%arg0: i32, %arg1: i32, %arg2: memref<16x32xf32, #tpu.memory_space<vmem>>, %arg3: memref<32x96xbf16, #tpu.memory_space<vmem>>, %arg4: memref<1x96xf32, #tpu.memory_space<vmem>>, %arg5: memref<2xf32, #tpu.memory_space<smem>>, %arg6: memref<16x96xbf16, #tpu.memory_space<vmem>>, %arg7: memref<16x32xbf16, #tpu.memory_space<vmem>>) attributes {dimension_semantics = [#tpu.dimension_semantics<parallel>, #tpu.dimension_semantics<arbitrary>], iteration_bounds = array<i64: 1, 1>, scalar_prefetch = 0 : i64, scratch_operands = 1 : i64, tpu.core_type = #tpu.core_type<tc>, window_params = [{transform_indices = @transform_0, window_bounds = array<i64: 16, 32>}, {transform_indices = @transform_1, window_bounds = array<i64: 32, 96>}, {transform_indices = @transform_2, window_bounds = array<i64: 1, 96>}, {transform_indices = @transform_3, window_bounds = array<i64: 2>}, {transform_indices = @transform_4, window_bounds = array<i64: 16, 96>}]} {
    %c0_i32 = arith.constant 0 : i32
    %0 = arith.cmpi eq, %arg1, %c0_i32 : i32
    %1 = arith.extui %0 : i1 to i32
    %c0_i32_0 = arith.constant 0 : i32
    %2 = arith.cmpi ne, %1, %c0_i32_0 : i32
    scf.if %2 {
      %c0_8 = arith.constant 0 : index
      %c0_9 = arith.constant 0 : index
      %11 = vector.load %arg2[%c0_8, %c0_9] : memref<16x32xf32, #tpu.memory_space<vmem>>, vector<16x32xf32>
      %cst_10 = arith.constant dense<0.000000e+00> : vector<16xf32>
      %12 = vector.multi_reduction <add>, %11, %cst_10 [1] : vector<16x32xf32> to vector<16xf32>
      %13 = vector.shape_cast %12 : vector<16xf32> to vector<16x1xf32>
      %cst_11 = arith.constant 3.200000e+01 : f32
      %14 = vector.broadcast %cst_11 : f32 to vector<16x1xf32>
      %15 = arith.divf %13, %14 : vector<16x1xf32>
      %16 = vector.broadcast %15 : vector<16x1xf32> to vector<16x32xf32>
      %17 = arith.subf %11, %16 : vector<16x32xf32>
      %18 = arith.mulf %17, %17 : vector<16x32xf32>
      %cst_12 = arith.constant dense<0.000000e+00> : vector<16xf32>
      %19 = vector.multi_reduction <add>, %18, %cst_12 [1] : vector<16x32xf32> to vector<16xf32>
      %20 = vector.shape_cast %19 : vector<16xf32> to vector<16x1xf32>
      %cst_13 = arith.constant 3.100000e+01 : f32
      %21 = vector.broadcast %cst_13 : f32 to vector<16x1xf32>
      %22 = arith.divf %20, %21 : vector<16x1xf32>
      %23 = math.sqrt %22 : vector<16x1xf32>
      %cst_14 = arith.constant 9.99999997E-7 : f32
      %24 = vector.broadcast %cst_14 : f32 to vector<16x1xf32>
      %25 = arith.addf %23, %24 : vector<16x1xf32>
      %cst_15 = arith.constant 1.000000e+00 : f32
      %26 = vector.broadcast %cst_15 : f32 to vector<16x1xf32>
      %27 = arith.divf %26, %25 : vector<16x1xf32>
      %c0_16 = arith.constant 0 : index
      %28 = memref.load %arg5[%c0_16] : memref<2xf32, #tpu.memory_space<smem>>
      %29 = vector.broadcast %15 : vector<16x1xf32> to vector<16x32xf32>
      %30 = arith.subf %11, %29 : vector<16x32xf32>
      %31 = vector.broadcast %28 : f32 to vector<16x32xf32>
      %32 = arith.mulf %31, %30 : vector<16x32xf32>
      %33 = vector.broadcast %27 : vector<16x1xf32> to vector<16x32xf32>
      %34 = arith.mulf %32, %33 : vector<16x32xf32>
      %c1 = arith.constant 1 : index
      %35 = memref.load %arg5[%c1] : memref<2xf32, #tpu.memory_space<smem>>
      %36 = vector.broadcast %35 : f32 to vector<16x32xf32>
      %37 = arith.addf %34, %36 : vector<16x32xf32>
      %38 = arith.truncf %37 : vector<16x32xf32> to vector<16x32xbf16>
      %c0_17 = arith.constant 0 : index
      %c0_18 = arith.constant 0 : index
      %39 = vector.load %arg7[%c0_17, %c0_18] : memref<16x32xbf16, #tpu.memory_space<vmem>>, vector<16x32xbf16>
      tpu.vector_store %arg7[%c0_17, %c0_18], %38 {strides = array<i32>} : memref<16x32xbf16, #tpu.memory_space<vmem>>, vector<16x32xbf16>,
    } else {
    }
    %c0 = arith.constant 0 : index
    %c0_1 = arith.constant 0 : index
    %3 = vector.load %arg7[%c0, %c0_1] : memref<16x32xbf16, #tpu.memory_space<vmem>>, vector<16x32xbf16>
    %c0_2 = arith.constant 0 : index
    %c0_3 = arith.constant 0 : index
    %4 = vector.load %arg3[%c0_2, %c0_3] : memref<32x96xbf16, #tpu.memory_space<vmem>>, vector<32x96xbf16>
    %cst = arith.constant dense<0.000000e+00> : vector<16x96xf32>
    %5 = tpu.matmul %3, %4, %cst {dimension_numbers = #tpu.dot_dimension_numbers<[1], [0], [0], [1], [0, 0, 1, 1], [], []>} : vector<16x32xbf16>, vector<32x96xbf16>, vector<16x96xf32> -> vector<16x96xf32>
    %c0_4 = arith.constant 0 : index
    %c0_5 = arith.constant 0 : index
    %6 = vector.load %arg4[%c0_4, %c0_5] : memref<1x96xf32, #tpu.memory_space<vmem>>, vector<1x96xf32>
    %7 = vector.broadcast %6 : vector<1x96xf32> to vector<16x96xf32>
    %8 = arith.addf %5, %7 : vector<16x96xf32>
    %9 = arith.truncf %8 : vector<16x96xf32> to vector<16x96xbf16>
    %c0_6 = arith.constant 0 : index
    %c0_7 = arith.constant 0 : index
    %10 = vector.load %arg6[%c0_6, %c0_7] : memref<16x96xbf16, #tpu.memory_space<vmem>>, vector<16x96xbf16>
    tpu.vector_store %arg6[%c0_6, %c0_7], %9 {strides = array<i32>} : memref<16x96xbf16, #tpu.memory_space<vmem>>, vector<16x96xbf16>,
    return
  }
  func.func @transform_0(%arg0: i32, %arg1: i32) -> (i32, i32) {
    %c0_i32 = arith.constant 0 : i32
    %c0_i32_0 = arith.constant 0 : i32
    return %arg0, %c0_i32 : i32, i32
  }
  func.func @transform_1(%arg0: i32, %arg1: i32) -> (i32, i32) {
    %c0_i32 = arith.constant 0 : i32
    %c0_i32_0 = arith.constant 0 : i32
    return %c0_i32, %arg1 : i32, i32
  }
  func.func @transform_2(%arg0: i32, %arg1: i32) -> (i32, i32) {
    %c0_i32 = arith.constant 0 : i32
    %c0_i32_0 = arith.constant 0 : i32
    return %c0_i32, %arg1 : i32, i32
  }
  func.func @transform_3(%arg0: i32, %arg1: i32) -> i32 {
    %c0_i32 = arith.constant 0 : i32
    %c0_i32_0 = arith.constant 0 : i32
    return %c0_i32 : i32
  }
  func.func @transform_4(%arg0: i32, %arg1: i32) -> (i32, i32) {
    %c0_i32 = arith.constant 0 : i32
    return %arg0, %arg1 : i32, i32
  }
}

module attributes {stable_mosaic.version = 11 : i64} {
  func.func @matmul_residual_k1_kernel(%arg0: i32, %arg1: i32, %arg2: memref<16x32xbf16, #tpu.memory_space<vmem>>, %arg3: memref<32x32xbf16, #tpu.memory_space<vmem>>, %arg4: memref<1x32xf32, #tpu.memory_space<vmem>>, %arg5: memref<16x32xf32, #tpu.memory_space<vmem>>, %arg6: memref<16x32xf32, #tpu.memory_space<vmem>>) attributes {dimension_semantics = [#tpu.dimension_semantics<parallel>, #tpu.dimension_semantics<parallel>], iteration_bounds = array<i64: 1, 1>, scalar_prefetch = 0 : i64, scratch_operands = 0 : i64, tpu.core_type = #tpu.core_type<tc>, window_params = [{transform_indices = @transform_0, window_bounds = array<i64: 16, 32>}, {transform_indices = @transform_1, window_bounds = array<i64: 32, 32>}, {transform_indices = @transform_2, window_bounds = array<i64: 1, 32>}, {transform_indices = @transform_3, window_bounds = array<i64: 16, 32>}, {transform_indices = @transform_4, window_bounds = array<i64: 16, 32>}]} {
    %c0 = arith.constant 0 : index
    %c0_0 = arith.constant 0 : index
    %0 = vector.load %arg2[%c0, %c0_0] : memref<16x32xbf16, #tpu.memory_space<vmem>>, vector<16x32xbf16>
    %c0_1 = arith.constant 0 : index
    %c0_2 = arith.constant 0 : index
    %1 = vector.load %arg3[%c0_1, %c0_2] : memref<32x32xbf16, #tpu.memory_space<vmem>>, vector<32x32xbf16>
    %cst = arith.constant dense<0.000000e+00> : vector<16x32xf32>
    %2 = tpu.matmul %0, %1, %cst {dimension_numbers = #tpu.dot_dimension_numbers<[1], [0], [0], [1], [0, 0, 1, 1], [], []>} : vector<16x32xbf16>, vector<32x32xbf16>, vector<16x32xf32> -> vector<16x32xf32>
    %c0_3 = arith.constant 0 : index
    %c0_4 = arith.constant 0 : index
    %3 = vector.load %arg4[%c0_3, %c0_4] : memref<1x32xf32, #tpu.memory_space<vmem>>, vector<1x32xf32>
    %4 = vector.broadcast %3 : vector<1x32xf32> to vector<16x32xf32>
    %5 = arith.addf %2, %4 : vector<16x32xf32>
    %c0_5 = arith.constant 0 : index
    %c0_6 = arith.constant 0 : index
    %6 = vector.load %arg5[%c0_5, %c0_6] : memref<16x32xf32, #tpu.memory_space<vmem>>, vector<16x32xf32>
    %7 = arith.addf %5, %6 : vector<16x32xf32>
    %c0_7 = arith.constant 0 : index
    %c0_8 = arith.constant 0 : index
    %8 = vector.load %arg6[%c0_7, %c0_8] : memref<16x32xf32, #tpu.memory_space<vmem>>, vector<16x32xf32>
    tpu.vector_store %arg6[%c0_7, %c0_8], %7 {strides = array<i32>} : memref<16x32xf32, #tpu.memory_space<vmem>>, vector<16x32xf32>,
    return
  }
  func.func @transform_0(%arg0: i32, %arg1: i32) -> (i32, i32) {
    %c0_i32 = arith.constant 0 : i32
    %c0_i32_0 = arith.constant 0 : i32
    return %arg0, %c0_i32 : i32, i32
  }
  func.func @transform_1(%arg0: i32, %arg1: i32) -> (i32, i32) {
    %c0_i32 = arith.constant 0 : i32
    %c0_i32_0 = arith.constant 0 : i32
    return %c0_i32, %arg1 : i32, i32
  }
  func.func @transform_2(%arg0: i32, %arg1: i32) -> (i32, i32) {
    %c0_i32 = arith.constant 0 : i32
    %c0_i32_0 = arith.constant 0 : i32
    return %c0_i32, %arg1 : i32, i32
  }
  func.func @transform_3(%arg0: i32, %arg1: i32) -> (i32, i32) {
    %c0_i32 = arith.constant 0 : i32
    return %arg0, %arg1 : i32, i32
  }
  func.func @transform_4(%arg0: i32, %arg1: i32) -> (i32, i32) {
    %c0_i32 = arith.constant 0 : i32
    return %arg0, %arg1 : i32, i32
  }
}

module attributes {stable_mosaic.version = 11 : i64} {
  func.func @layernorm_kernel(%arg0: i32, %arg1: memref<16x32xf32, #tpu.memory_space<vmem>>, %arg2: memref<2xf32, #tpu.memory_space<smem>>, %arg3: memref<16x32xf32, #tpu.memory_space<vmem>>) attributes {dimension_semantics = [#tpu.dimension_semantics<parallel>], iteration_bounds = array<i64: 1>, scalar_prefetch = 0 : i64, scratch_operands = 0 : i64, tpu.core_type = #tpu.core_type<tc>, window_params = [{transform_indices = @transform_0, window_bounds = array<i64: 16, 32>}, {transform_indices = @transform_1, window_bounds = array<i64: 2>}, {transform_indices = @transform_2, window_bounds = array<i64: 16, 32>}]} {
    %c0 = arith.constant 0 : index
    %c0_0 = arith.constant 0 : index
    %0 = vector.load %arg1[%c0, %c0_0] : memref<16x32xf32, #tpu.memory_space<vmem>>, vector<16x32xf32>
    %cst = arith.constant dense<0.000000e+00> : vector<16xf32>
    %1 = vector.multi_reduction <add>, %0, %cst [1] : vector<16x32xf32> to vector<16xf32>
    %2 = vector.shape_cast %1 : vector<16xf32> to vector<16x1xf32>
    %cst_1 = arith.constant 3.200000e+01 : f32
    %3 = vector.broadcast %cst_1 : f32 to vector<16x1xf32>
    %4 = arith.divf %2, %3 : vector<16x1xf32>
    %5 = vector.broadcast %4 : vector<16x1xf32> to vector<16x32xf32>
    %6 = arith.subf %0, %5 : vector<16x32xf32>
    %7 = arith.mulf %6, %6 : vector<16x32xf32>
    %cst_2 = arith.constant dense<0.000000e+00> : vector<16xf32>
    %8 = vector.multi_reduction <add>, %7, %cst_2 [1] : vector<16x32xf32> to vector<16xf32>
    %9 = vector.shape_cast %8 : vector<16xf32> to vector<16x1xf32>
    %cst_3 = arith.constant 3.100000e+01 : f32
    %10 = vector.broadcast %cst_3 : f32 to vector<16x1xf32>
    %11 = arith.divf %9, %10 : vector<16x1xf32>
    %12 = math.sqrt %11 : vector<16x1xf32>
    %cst_4 = arith.constant 9.99999997E-7 : f32
    %13 = vector.broadcast %cst_4 : f32 to vector<16x1xf32>
    %14 = arith.addf %12, %13 : vector<16x1xf32>
    %cst_5 = arith.constant 1.000000e+00 : f32
    %15 = vector.broadcast %cst_5 : f32 to vector<16x1xf32>
    %16 = arith.divf %15, %14 : vector<16x1xf32>
    %c0_6 = arith.constant 0 : index
    %17 = memref.load %arg2[%c0_6] : memref<2xf32, #tpu.memory_space<smem>>
    %18 = vector.broadcast %4 : vector<16x1xf32> to vector<16x32xf32>
    %19 = arith.subf %0, %18 : vector<16x32xf32>
    %20 = vector.broadcast %17 : f32 to vector<16x32xf32>
    %21 = arith.mulf %20, %19 : vector<16x32xf32>
    %22 = vector.broadcast %16 : vector<16x1xf32> to vector<16x32xf32>
    %23 = arith.mulf %21, %22 : vector<16x32xf32>
    %c1 = arith.constant 1 : index
    %24 = memref.load %arg2[%c1] : memref<2xf32, #tpu.memory_space<smem>>
    %25 = vector.broadcast %24 : f32 to vector<16x32xf32>
    %26 = arith.addf %23, %25 : vector<16x32xf32>
    %c0_7 = arith.constant 0 : index
    %c0_8 = arith.constant 0 : index
    %27 = vector.load %arg3[%c0_7, %c0_8] : memref<16x32xf32, #tpu.memory_space<vmem>>, vector<16x32xf32>
    tpu.vector_store %arg3[%c0_7, %c0_8], %26 {strides = array<i32>} : memref<16x32xf32, #tpu.memory_space<vmem>>, vector<16x32xf32>,
    return
  }
  func.func @transform_0(%arg0: i32) -> (i32, i32) {
    %c0_i32 = arith.constant 0 : i32
    %c0_i32_0 = arith.constant 0 : i32
    return %arg0, %c0_i32 : i32, i32
  }
  func.func @transform_1(%arg0: i32) -> i32 {
    %c0_i32 = arith.constant 0 : i32
    %c0_i32_0 = arith.constant 0 : i32
    return %c0_i32 : i32
  }
  func.func @transform_2(%arg0: i32) -> (i32, i32) {
    %c0_i32 = arith.constant 0 : i32
    %c0_i32_0 = arith.constant 0 : i32
    return %arg0, %c0_i32 : i32, i32
  }
}

</mosaic_0001>

<bundles_post_ra>
// kernel: encoder_forward.11
= control target key start
LH: loop header
LB: loop body
LE: loop exit
PB: predicated region body
PF: predicated region fallthrough
CT: control target
= control target key end

     0   :  { %9 = vsyncpa [#allocation3], 0  ;;  %s231_s0 = inlined_call_operand.vmem [shape: bf16[16,32], index: 0, kind: input, shape index: {}]   ;;  %s232_s1 = inlined_call_operand.hbm [shape: bf16[32,32], index: 1, kind: input, shape index: {}]   ;;  %s233_s2 = inlined_call_operand.vmem [shape: f32[1,32], index: 2, kind: input, shape index: {}]   ;;  %s234_s3 = inlined_call_operand.hbm [shape: f32[16,32], index: 3, kind: input, shape index: {}]   ;;  %s235_s4 = inlined_call_operand.vmem [shape: f32[16,32], index: 4, kind: output, shape index: {}]  }
   0x1   :  { %s17_s17 = sshll.u32 %s232_s1, 4  ;;  %s18_s17 = int_to_ptr.hbm [resolvable:$true] %s17_s17 }
   0x2   :  { %10 = vsyncpa [#allocation5], 0  ;;  %s182_s18 = smov [#allocation2]   ;;  %s32_s22 = sshll.u32 %s234_s3, 4  ;;  %s33_s22 = int_to_ptr.hbm [resolvable:$true] %s32_s22 }
   0x3   :  { %s19_s19 = sshll.u32 %s182_s18, 4  ;;  %s183_s23 = smov 64   ;;  %s20_s19 = int_to_ptr.vmem [resolvable:$true] %s19_s19 }
   0x4   :  { %s184_s24 = smov 4   ;;  %s185_s25 = smov [#allocation4]  }
   0x5   :  { %25 = dma.hbm_to_vmem [thread:$0]  %s18_s17, 256, %s20_s19, [#allocation3], %s183_s23, %s183_s23, %s184_s24  }
   0x6   :  { %s34_s26 = sshll.u32 %s185_s25, 4  ;;  %s186_s27 = smov 128   ;;  %s35_s26 = int_to_ptr.vmem [resolvable:$true] %s34_s26 }
   0x7   :  { %s187_s28 = smov 8  }
   0x8   :  { %40 = dma.hbm_to_vmem [thread:$0]  %s33_s22, 256, %s35_s26, [#allocation5], %s186_s27, %s186_s27, %s187_s28  }
   0x9   :  { %178 = dma.done.wait [#allocation3], 256  }
   0xa   :  { %179 = vsyncadd [#allocation3], 4294967040 }
   0xb   :  { %180 = dma.done.wait [#allocation5], 256  }
   0xc   :  { %181 = vsyncadd [#allocation5], 4294967040  ;;  %v122_v0 = vld [vmem:[#allocation2 + $0x8] sm:$0xff]  ;;  %v121_v1 = vld [vmem:[#allocation2] sm:$0xff]  ;;  %vm77_vm0 = vcmask 261120  }
   0xd   :  { %87 = vmatpush.bf16.msra.mxu0 %v122_v0  ;;  %v120_v2 = vld [vmem:[%s231_s0] sm:$0xff]  ;;  %v95_v5 = vld [vmem:[#allocation4] sm:$0xff]  ;;  %v96_v9 = vld [vmem:[#allocation4 + $0x8] sm:$0xff] }
   0xe   :  { %v129_v3 = vld [vmem:[%s233_s2] ss:$0 sm:$0xff] }
  0x11   :  { %88 = vmatpush.bf16.msra.mxu0 %v121_v1 }
  0x14   :  { %119 = vmatmul.msk.bf16.vlgmr.msra.gmra.mxu0 %vm77_vm0, %v120_v2 }
  0x91   :  { %v90_v4 = vpop.f32.mrf.mxu0 }
  0x92   :  { %v91_v6 = vadd.f32 %v129_v3, %v90_v4 }
  0x94   :  { %v97_v7 = vadd.f32 %v95_v5, %v91_v6 }
  0x96   :  { %99 = vst.msk [vmem:[%s235_s4] sm:$0xff] %vm77_vm0, %v97_v7 }
  0x99   :  { %v92_v8 = vpop.f32.mrf.mxu0 }
  0x9a   :  { %v93_v10 = vadd.f32 %v129_v3, %v92_v8 }
  0x9c   :  { %v98_v11 = vadd.f32 %v96_v9, %v93_v10 }
  0x9e   :  { %100 = vst.msk [vmem:[%s235_s4 + $0x8] sm:$0xff] %vm77_vm0, %v98_v11 }
  0x9f   :  { %105 = vsyncpa [#allocation3], 1 }
  0xa0   :  { %106 = vsyncpa [#allocation5], 1 }

// kernel: encoder_forward.9
= control target key start
LH: loop header
LB: loop body
LE: loop exit
PB: predicated region body
PF: predicated region fallthrough
CT: control target
= control target key end

     0   :  { %9 = vsyncpa [#allocation4], 0  ;;  %s410_s0 = inlined_call_operand.hbm [shape: f32[16,32], index: 0, kind: input, shape index: {}]   ;;  %s411_s1 = inlined_call_operand.hbm [shape: bf16[32,96], index: 1, kind: input, shape index: {}]   ;;  %s412_s2 = inlined_call_operand.vmem [shape: f32[1,96], index: 2, kind: input, shape index: {}]   ;;  %s413_s3 = inlined_call_operand.vmem [shape: f32[2], index: 3, kind: input, shape index: {}]   ;;  %s414_s4 = inlined_call_operand.vmem [shape: bf16[16,96], index: 4, kind: output, shape index: {}]  }
   0x1   :  { %10 = vsyncpa [#allocation7], 0  ;;  %s16_s17 = sshll.u32 %s410_s0, 4  ;;  %s17_s17 = int_to_ptr.hbm [resolvable:$true] %s16_s17 }
   0x2   :  { %11 = vsyncpa [#allocation5], 0  ;;  %s337_s18 = smov [#allocation3]   ;;  %s29_s22 = sshll.u32 %s411_s1, 4  ;;  %s30_s22 = int_to_ptr.hbm [resolvable:$true] %s29_s22 }
   0x3   :  { %s18_s19 = sshll.u32 %s337_s18, 4  ;;  %s338_s23 = smov 128   ;;  %s19_s19 = int_to_ptr.vmem [resolvable:$true] %s18_s19 }
   0x4   :  { %s339_s24 = smov 8   ;;  %s340_s25 = smov [#allocation6]  }
   0x5   :  { %24 = dma.hbm_to_vmem [thread:$0]  %s17_s17, 256, %s19_s19, [#allocation4], %s338_s23, %s338_s23, %s339_s24  }
   0x6   :  { %s31_s26 = sshll.u32 %s340_s25, 4  ;;  %s341_s27 = smov 64   ;;  %s32_s26 = int_to_ptr.vmem [resolvable:$true] %s31_s26 }
   0x7   :  { %s342_s28 = smov 4   ;;  %s45_s30 = sshll.u32 %s413_s3, 4  ;;  %s46_s30 = int_to_ptr.vmem [resolvable:$true] %s45_s30 }
   0x8   :  { %37 = dma.hbm_to_vmem [thread:$0]  %s30_s22, 256, %s32_s26, [#allocation7], %s341_s27, %s341_s27, %s342_s28  }
   0x9   :  { %s343_s5 = smov [#allocation8]  }
   0xa   :  { %48 = dma.vmem_to_smem %s46_s30, 16, %s343_s5, [#allocation5]  }
   0xb   :  { %331 = dma.done.wait [#allocation4], 256  }
   0xc   :  { %332 = vsyncadd [#allocation4], 4294967040 }
   0xd   :  { %333 = dma.done.wait [#allocation7], 256  }
   0xe   :  { %334 = vsyncadd [#allocation7], 4294967040 }
   0xf   :  { %335 = dma.done.wait [#allocation5], 16  }
  0x10   :  { %336 = vsyncadd [#allocation5], 4294967280 }
  0x11   :  { %61 = sfence }
  0x12   :  { %v67_v0 = vld [vmem:[#allocation3] sm:$0xff]  ;;  %vm69_vm0 = vcmask 261120   ;;  %v68_v2 = vld [vmem:[#allocation3 + $0x8] sm:$0xff]  ;;  %v344_v4 = vmov 32.0   ;;  %v345_v21 = vmov 31.0   ;;  %v248_v40 = vld [vmem:[#allocation6 + $0x8] sm:$0xff] }
  0x13   :  { %v70_v1 = vsel %vm69_vm0, %v67_v0, 0.0  ;;  %v73_v3 = vsel %vm69_vm0, %v68_v2, 0.0  ;;  %259 = vrcp.f32 %v344_v4  ;;  %212 = vmatpush.bf16.msra.mxu0 %v248_v40  ;;  %v247_v43 = vld [vmem:[#allocation6] sm:$0xff]  ;;  %s392_s1 = sld [smem:[#allocation8]]  ;;  %vm172_vm12 = vcmask 257024  }
  0x14   :  { %71 = vadd.xlane.f32.xlu0 %v70_v1  ;;  %261 = vrcp.f32 %v345_v21  ;;  %s394_s3 = sld [smem:[#allocation8 + $0x1]] }
  0x17   :  { %213 = vmatpush.bf16.msra.mxu0 %v247_v43 }
  0x19   :  { %v260_v5 = vpop.eup %259  ;;  %v161_v62 = vstv %s392_s1 }
  0x1a   :  { %v77_v6 = vmul.f32 32.0, %v260_v5  ;;  %vm81_vm1 = vweird.f32 %v260_v5  ;;  %v262_v22 = vpop.eup %261 }
  0x1b   :  { %v96_v23 = vmul.f32 31.0, %v262_v22  ;;  %vm100_vm2 = vweird.f32 %v262_v22 }
  0x1c   :  { %74 = vadd.xlane.f32.xlu0 %v73_v3  ;;  %v78_v7 = vsub.f32 1.0, %v77_v6  ;;  %v167_v6 = vstv %s394_s3 }
  0x1d   :  { %v97_v24 = vsub.f32 1.0, %v96_v23 }
  0x1e   :  { %v79_v8 = vmul.f32 %v260_v5, %v78_v7 }
  0x1f   :  { %v98_v25 = vmul.f32 %v262_v22, %v97_v24  ;;  %v258_v24 = vld [vmem:[%s412_s2] ss:$0 sm:$0xff] }
  0x20   :  { %v80_v9 = vadd.f32 %v260_v5, %v79_v8 }
  0x21   :  { %v99_v26 = vadd.f32 %v262_v22, %v98_v25 }
  0x22   :  { %v82_v10 = vsel %vm81_vm1, %v260_v5, %v80_v9  ;;  %vm222_vm1 = vcmask 781312  }
  0x23   :  { %v101_v27 = vsel %vm100_vm2, %v262_v22, %v99_v26 }
  0x87   :  { %v72_v11 = vpop.xlane.xlu0 %71 }
  0x88   :  { %v83_v12 = vmul.f32 %v82_v10, %v72_v11 }
  0x8a   :  { %v382_v13 = vsub.f32 %v67_v0, %v83_v12 }
  0x8c   :  { %v87_v14 = vmul.f32 %v382_v13, %v382_v13 }
  0x8e   :  { %v89_v15 = vsel %vm69_vm0, %v87_v14, 0.0 }
  0x8f   :  { %90 = vadd.xlane.f32.xlu1 %v89_v15  ;;  %v75_v16 = vpop.xlane.xlu0 %74 }
  0x90   :  { %v84_v17 = vmul.f32 %v82_v10, %v75_v16 }
  0x92   :  { %v387_v18 = vsub.f32 %v68_v2, %v84_v17  ;;  %v162_v2 = vmul.f32 %v161_v62, %v382_v13 }
  0x94   :  { %v88_v19 = vmul.f32 %v387_v18, %v387_v18  ;;  %v163_v13 = vmul.f32 %v161_v62, %v387_v18 }
  0x96   :  { %v92_v20 = vsel %vm69_vm0, %v88_v19, 0.0 }
  0x97   :  { %93 = vadd.xlane.f32.xlu1 %v92_v20 }
 0x102   :  { %v91_v28 = vpop.xlane.xlu1 %90 }
 0x103   :  { %v102_v29 = vmul.f32 %v101_v27, %v91_v28 }
 0x105   :  { %263 = vrsqrt.f32 %v102_v29  ;;  %vm111_vm3 = vcmp.eq.f32.partialorder %v102_v29, inf  ;;  %v114_v44 = vand.u32 2147483648, %v102_v29  ;;  %vm113_vm4 = vcmp.eq.f32.partialorder %v102_v29, 0.0 }
 0x10a   :  { %v94_v30 = vpop.xlane.xlu1 %93 }
 0x10b   :  { %v264_v31 = vpop.eup %263  ;;  %v103_v32 = vmul.f32 %v101_v27, %v94_v30 }
 0x10c   :  { %v105_v33 = vmul.f32 %v264_v31, %v102_v29 }
 0x10d   :  { %265 = vrsqrt.f32 %v103_v32  ;;  %vm123_vm5 = vcmp.eq.f32.partialorder %v103_v32, inf  ;;  %v126_v52 = vand.u32 2147483648, %v103_v32  ;;  %vm125_vm6 = vcmp.eq.f32.partialorder %v103_v32, 0.0 }
 0x10e   :  { %v106_v34 = vmul.f32 %v264_v31, %v105_v33 }
 0x110   :  { %v107_v35 = vmul.f32 0.5, %v106_v34 }
 0x112   :  { %v108_v36 = vsub.f32 1.5, %v107_v35 }
 0x113   :  { %v266_v37 = vpop.eup %265 }
 0x114   :  { %v109_v38 = vmul.f32 %v264_v31, %v108_v36  ;;  %v117_v39 = vmul.f32 %v266_v37, %v103_v32 }
 0x116   :  { %v110_v41 = vmul.f32 %v109_v38, %v102_v29  ;;  %v118_v42 = vmul.f32 %v266_v37, %v117_v39 }
 0x118   :  { %v112_v45 = vsel %vm111_vm3, %v102_v29, %v110_v41  ;;  %v119_v46 = vmul.f32 0.5, %v118_v42 }
 0x119   :  { %v115_v47 = vsel %vm113_vm4, %v114_v44, %v112_v45 }
 0x11a   :  { %v128_v48 = vadd.f32 1e-06, %v115_v47  ;;  %v120_v49 = vsub.f32 1.5, %v119_v46 }
 0x11c   :  { %267 = vrcp.f32 %v128_v48  ;;  %v121_v50 = vmul.f32 %v266_v37, %v120_v49  ;;  %v141_v59 = vand.u32 2147483648, %v128_v48  ;;  %v139_v61 = vand.u32 2147483647, %v128_v48 }
 0x11d   :  { %vm135_vm8 = vweird.f32 %v128_v48 }
 0x11e   :  { %v122_v51 = vmul.f32 %v121_v50, %v103_v32  ;;  %v142_v0 = vor.u32 1.1754944e-38, %v141_v59  ;;  %vm140_vm10 = vcmp.eq.f32.partialorder %v139_v61, 8.507059e+37 }
 0x120   :  { %v124_v53 = vsel %vm123_vm5, %v103_v32, %v122_v51 }
 0x121   :  { %v127_v55 = vsel %vm125_vm6, %v126_v52, %v124_v53 }
 0x122   :  { %v268_v54 = vpop.eup %267  ;;  %v129_v57 = vadd.f32 1e-06, %v127_v55 }
 0x123   :  { %v131_v56 = vmul.f32 %v268_v54, %v128_v48  ;;  %vm136_vm7 = vweird.f32 %v268_v54 }
 0x124   :  { %269 = vrcp.f32 %v129_v57  ;;  %vm137_vm9 = vmor %vm135_vm8, %vm136_vm7  ;;  %v156_v9 = vand.u32 2147483648, %v129_v57  ;;  %v154_v12 = vand.u32 2147483647, %v129_v57  ;;  %vm150_vm13 = vweird.f32 %v129_v57 }
 0x125   :  { %v132_v58 = vsub.f32 1.0, %v131_v56 }
 0x126   :  { %v157_v16 = vor.u32 1.1754944e-38, %v156_v9  ;;  %vm155_vm15 = vcmp.eq.f32.partialorder %v154_v12, 8.507059e+37 }
 0x127   :  { %v133_v60 = vmul.f32 %v268_v54, %v132_v58 }
 0x129   :  { %v134_v63 = vadd.f32 %v268_v54, %v133_v60 }
 0x12a   :  { %v270_v1 = vpop.eup %269 }
 0x12b   :  { %v138_v3 = vsel %vm137_vm9, %v268_v54, %v134_v63  ;;  %v146_v4 = vmul.f32 %v270_v1, %v129_v57  ;;  %vm151_vm11 = vweird.f32 %v270_v1 }
 0x12c   :  { %v143_v5 = vsel %vm140_vm10, %v142_v0, %v138_v3  ;;  %vm152_vm14 = vmor %vm150_vm13, %vm151_vm11 }
 0x12d   :  { %v164_v7 = vmul.f32 %v162_v2, %v143_v5  ;;  %v147_v8 = vsub.f32 1.0, %v146_v4 }
 0x12f   :  { %v168_v10 = vadd.f32 %v167_v6, %v164_v7  ;;  %v148_v11 = vmul.f32 %v270_v1, %v147_v8 }
 0x131   :  { %v170_v14 = vpack.c.bf16 %v168_v10, %v168_v10  ;;  %v149_v15 = vadd.f32 %v270_v1, %v148_v11 }
 0x133   :  { %173 = vst.msk [vmem:[#allocation2] sm:$0xf] %vm172_vm12, %v170_v14  ;;  %v153_v17 = vsel %vm152_vm14, %v270_v1, %v149_v15 }
 0x134   :  { %v158_v19 = vsel %vm155_vm15, %v157_v16, %v153_v17 }
 0x135   :  { %v165_v20 = vmul.f32 %v163_v13, %v158_v19 }
 0x137   :  { %v169_v21 = vadd.f32 %v167_v6, %v165_v20 }
 0x139   :  { %v171_v22 = vpack.c.bf16 %v169_v21, %v169_v21 }
 0x13b   :  { %174 = vst.msk [vmem:[#allocation2 + $0x4] sm:$0xf] %vm172_vm12, %v171_v22 }
 0x142   :  { %v246_v23 = vld [vmem:[#allocation2] sm:$0xff] }
 0x143   :  { %245 = vmatmul.msk.bf16.vlgmr.msra.gmra.mxu0 %vm69_vm0, %v246_v23 }
 0x1c0   :  { %v215_v25 = vpop.f32.mrf.mxu0 }
 0x1c1   :  { %v216_v26 = vadd.f32 %v258_v24, %v215_v25 }
 0x1c3   :  { %v220_v27 = vpack.c.bf16 %v216_v26, %v216_v26 }
 0x1c5   :  { %223 = vst.msk [vmem:[%s414_s4] sm:$0xf] %vm222_vm1, %v220_v27 }
 0x1c8   :  { %v217_v18 = vpop.f32.mrf.mxu0 }
 0x1c9   :  { %v218_v28 = vadd.f32 %v258_v24, %v217_v18 }
 0x1cb   :  { %v221_v29 = vpack.c.bf16 %v218_v28, %v218_v28 }
 0x1cd   :  { %224 = vst.msk [vmem:[%s414_s4 + $0x4] sm:$0xf] %vm222_vm1, %v221_v29 }
 0x1ce   :  { %229 = vsyncpa [#allocation4], 1 }
 0x1cf   :  { %230 = vsyncpa [#allocation7], 1 }
 0x1d0   :  { %231 = vsyncpa [#allocation5], 1 }

// kernel: encoder_forward.10
= control target key start
LH: loop header
LB: loop body
LE: loop exit
PB: predicated region body
PF: predicated region fallthrough
CT: control target
= control target key end

     0   :  { %s569_s9 = smov 0   ;;  %s642_s0 = inlined_call_operand.vmem [shape: bf16[2,8,96], index: 0, kind: input, shape index: {}]   ;;  %s643_s1 = inlined_call_operand.vmem [shape: f32[2,1,8], index: 1, kind: input, shape index: {}]   ;;  %s644_s2 = inlined_call_operand.vmem [shape: bf16[2,8,32], index: 2, kind: output, shape index: {}]  }
   0x1 LB: > { %s476_s10 = sadd.s32 4294967295, %s538_s9   ;;  %p480_p0 = scmp.ge.s32.totalorder %s538_s9, 1  ;;  %s538_s9 = sphi %s569_s9, %s12_s9  }
   0x2   : > { %p119_p1 = scmp.lt.s32.totalorder %s538_s9, 3 }
   0x4   : > { %p120_p2 = pnand %p480_p0, %p119_p1 }
   0x5   : > { %p142_p3 = scmp.lt.s32.totalorder (!%p120_p2), %s476_s10, 1  ;;  %s540_s18 = smov (!%p120_p2), 96  }
   0x6   : > { %123 = sbr.rel (%p120_p2) target bundleno = 1196 (0x4ac), region = 28  ;;  %s541_s19 = smov (!%p120_p2), 88  }
   0x7   : > { %s542_s20 = smov (!%p120_p2), 120   ;;  %s543_s21 = smov (!%p120_p2), 64  }
   0x8   : > { %s544_s22 = smov (!%p120_p2), 80   ;;  %s545_s23 = smov (!%p120_p2), 72  }
   0x9   : > { %s546_s24 = smov (!%p120_p2), 112   ;;  %s547_s25 = smov (!%p120_p2), 104  }
   0xa   : > { %s548_s28 = smov (!%p120_p2), 56   ;;  %s549_s29 = smov (!%p120_p2), 40  }
   0xb   : > { %s646_s10 = smov (!%p142_p3, %s476_s10), 1  ;;  %vm167_vm0 = vcmask 64512   ;;  %vm204_vm1 = vcmask 1043456   ;;  %vm222_vm2 = vcmask 60416   ;;  %s550_s5 = smov 48   ;;  %vm286_vm3 = vcmask 126016  }
   0xc   : > { %s481_s11 = sshll.u32 %s646_s10, 2  ;;  %s148_s17 = scalar_lea.vmem %s643_s1, %s646_s10  ;;  %vm349_vm4 = vcmask 191616   ;;  %vm412_vm5 = vcmask 257216  }
   0xd   : > { %s145_s14 = scalar_lea.vmem %s642_s0, %s481_s11  ;;  %v515_v11 = vld [vmem:[%s148_s17] ss:$0 sm:$0xff]  ;;  %s622_s4 = scalar_lea.vmem %s644_s2, %s481_s11 }
   0xe   : > { %v154_v0 = vld [vmem:[%s145_s14] sm:$0xf]  ;;  %s551_s6 = smov 8   ;;  %s552_s7 = smov 16  }
   0xf   : > { %v163_v1 = vunpack.c.l.b16 %v154_v0  ;;  %v156_v3 = vunpack.c.l.bf16 %v154_v0  ;;  %s553_s8 = smov 24  }
  0x11   : > { %v589_v2 = vpack.c.b16 %v163_v1, %v163_v1  ;;  %v157_v6 = vmul.f32 0.35351563, %v156_v3 }
  0x13   : > { %165 = vrot.lane.b32.xlu0 %v589_v2, %s540_s18  ;;  %227 = vrot.lane.b32.xlu1 %v589_v2, %s541_s19  ;;  %v158_v7 = vpack.c.bf16 %v157_v6, %v157_v6 }
  0x15   : > { %225 = vrot.lane.b32.xlu2 %v158_v7, %s542_s20 }
  0x1d   : > { %199 = vrot.lane.b32.xlu2 %v589_v2, %s543_s21 }
  0x25   : > { %290 = vrot.lane.b32.xlu2 %v589_v2, %s544_s22 }
  0x2d   : > { %353 = vrot.lane.b32.xlu2 %v589_v2, %s545_s23 }
  0x35   : > { %288 = vrot.lane.b32.xlu2 %v158_v7, %s546_s24 }
  0x3d   : > { %351 = vrot.lane.b32.xlu2 %v158_v7, %s547_s25 }
  0x6f   : > { %v226_v10 = vpop.permute.xlu2 %225 }
  0x77   : > { %v200_v16 = vpop.permute.xlu2 %199 }
  0x78   : > { %v206_v21 = vsel %vm204_vm1, %v200_v16, 0 }
  0x79   : > { %215 = vmatpush.bf16.msra.mxu1 %v206_v21 }
  0x7f   : > { %v291_v17 = vpop.permute.xlu2 %290 }
  0x80   : > { %v296_v19 = vsel %vm167_vm0, %v291_v17, 0 }
  0x81   : > { %305 = vmatpush.bf16.xpose.msrb.mxu1 %v296_v19 }
  0x85   : > { %v166_v4 = vpop.permute.xlu0 %165  ;;  %v228_v8 = vpop.permute.xlu1 %227 }
  0x86   : > { %v172_v5 = vsel %vm167_vm0, %v166_v4, 0  ;;  %v233_v9 = vsel %vm167_vm0, %v228_v8, 0 }
  0x87   : > { %181 = vmatpush.bf16.xpose.msra.mxu0 %v172_v5  ;;  %242 = vmatpush.bf16.xpose.msra.mxu2 %v233_v9  ;;  %v354_v18 = vpop.permute.xlu2 %353 }
  0x88   : > { %v359_v20 = vsel %vm167_vm0, %v354_v18, 0 }
  0x8e   : > { %483 = vmatmul.msk.bf16.vlgmr.msra.gmra.mxu0 %vm167_vm0, %v158_v7  ;;  %485 = vmatmul.msk.bf16.vlgmr.msra.gmra.mxu2 %vm167_vm0, %v226_v10 }
  0x8f   : > { %368 = vmatpush.bf16.xpose.msrb.mxu0 %v359_v20  ;;  %v289_v22 = vpop.permute.xlu2 %288 }
  0x97   : > { %v352_v23 = vpop.permute.xlu2 %351 }
  0x9e   : > { %489 = vmatmul.msk.bf16.vlgmr.msrb.gmra.mxu0 %vm167_vm0, %v352_v23 }
 0x10b   : > { %v183_v12 = vpop.f32.mrf.mxu0 }
 0x10c   : > { %v184_v13 = vadd.f32 %v515_v11, %v183_v12 }
 0x10e   : > { %v187_v14 = vsel %vm167_vm0, %v184_v13, -inf }
 0x10f   : > { %188 = vmax.xlane.f32.xlu0 %v187_v14 }
 0x111   : > { %v244_v24 = vpop.f32.mrf.mxu2 }
 0x112   : > { %v245_v25 = vadd.f32 %v515_v11, %v244_v24 }
 0x113   : > { %v185_v15 = vpop.f32.mrf.mxu0 }
 0x114   : > { %v248_v27 = vsel %vm167_vm0, %v245_v25, -inf }
 0x115   : > { %249 = vmax.xlane.f32.xlu2 %v248_v27 }
 0x119   : > { %v246_v30 = vpop.f32.mrf.mxu2 }
 0x11b   : > { %v370_v33 = vpop.f32.mrf.mxu0 }
 0x11c   : > { %v371_v34 = vadd.f32 %v515_v11, %v370_v33 }
 0x11e   : > { %v374_v35 = vsel %vm167_vm0, %v371_v34, -inf }
 0x123   : > { %v372_v37 = vpop.f32.mrf.mxu0 }
 0x182   : > { %v189_v26 = vpop.xlane.xlu0 %188 }
 0x183   : > { %v190_v28 = vsub.f32 %v184_v13, %v189_v26 }
 0x185   : > { %v191_v29 = vmul.f32 1.442695, %v190_v28 }
 0x187   : > { %516 = vpow2.f32 %v191_v29 }
 0x188   : > { %v250_v43 = vpop.xlane.xlu2 %249 }
 0x189   : > { %v251_v45 = vsub.f32 %v245_v25, %v250_v43 }
 0x18b   : > { %v252_v46 = vmul.f32 1.442695, %v251_v45 }
 0x18d   : > { %v517_v31 = vpop.eup %516 }
 0x18e   : > { %v193_v32 = vsel %vm167_vm0, %v517_v31, 0.0 }
 0x18f   : > { %194 = vadd.xlane.f32.xlu1 %v193_v32 }
 0x197   : > { %375 = vmax.xlane.f32.xlu1 %v374_v35 }
 0x1b0   : > { %260 = vrot.lane.b32.xlu1 %v589_v2, %s548_s28 }
 0x1b8   : > { %386 = vrot.lane.b32.xlu1 %v589_v2, %s549_s29 }
 0x202   : > { %v195_v36 = vpop.xlane.xlu1 %194 }
 0x203   : > { %518 = vrcp.f32 %v195_v36 }
 0x204   : > { %520 = vpow2.f32 %v252_v46 }
 0x209   : > { %v519_v38 = vpop.eup %518 }
 0x20a   : > { %v197_v39 = vmul.f32 %v519_v38, %v517_v31  ;;  %v376_v47 = vpop.xlane.xlu1 %375  ;;  %v521_v53 = vpop.eup %520 }
 0x20b   : > { %v377_v50 = vsub.f32 %v371_v34, %v376_v47  ;;  %v254_v55 = vsel %vm167_vm0, %v521_v53, 0.0 }
 0x20c   : > { %v198_v40 = vpack.c.bf16 %v197_v39, %v197_v39 }
 0x20d   : > { %v378_v52 = vmul.f32 1.442695, %v377_v50 }
 0x20e   : > { %484 = vmatmul.msk.bf16.vlgmr.msra.gmra.mxu1 %vm167_vm0, %v198_v40 }
 0x20f   : > { %522 = vpow2.f32 %v378_v52 }
 0x215   : > { %v523_v56 = vpop.eup %522 }
 0x216   : > { %v380_v57 = vsel %vm167_vm0, %v523_v56, 0.0 }
 0x21e   : > { %487 = vmatmul.msk.bf16.vlgmr.msrb.gmra.mxu1 %vm167_vm0, %v289_v22 }
 0x222   : > { %v261_v58 = vpop.permute.xlu1 %260 }
 0x223   : > { %v266_v59 = vsel %vm204_vm1, %v261_v58, 0 }
 0x224   : > { %275 = vmatpush.bf16.msra.mxu3 %v266_v59 }
 0x22a   : > { %v387_v60 = vpop.permute.xlu1 %386 }
 0x22b   : > { %v392_v61 = vsel %vm204_vm1, %v387_v60, 0 }
 0x22c   : > { %401 = vmatpush.bf16.msrb.mxu2 %v392_v61 }
 0x28b   : > { %v217_v41 = vpop.f32.mrf.mxu1 }
 0x28c   : > { %v221_v42 = vpack.c.bf16 %v217_v41, %v217_v41 }
 0x28e   : > { %223 = vst.msk [vmem:[%s622_s4] sm:$0xf] %vm222_vm2, %v221_v42 }
 0x293   : > { %v219_v44 = vpop.f32.mrf.mxu1 }
 0x29b   : > { %v307_v48 = vpop.f32.mrf.mxu1 }
 0x29c   : > { %v308_v49 = vadd.f32 %v515_v11, %v307_v48 }
 0x29e   : > { %v311_v51 = vsel %vm167_vm0, %v308_v49, -inf }
 0x29f   : > { %312 = vmax.xlane.f32.xlu0 %v311_v51 }
 0x2a3   : > { %v309_v54 = vpop.f32.mrf.mxu1 }
 0x2a7   : > { %255 = vadd.xlane.f32.xlu0 %v254_v55 }
 0x2af   : > { %381 = vadd.xlane.f32.xlu0 %v380_v57 }
 0x312   : > { %v313_v62 = vpop.xlane.xlu0 %312 }
 0x313   : > { %v314_v63 = vsub.f32 %v308_v49, %v313_v62 }
 0x315   : > { %v315_v0 = vmul.f32 1.442695, %v314_v63 }
 0x317   : > { %524 = vpow2.f32 %v315_v0 }
 0x31a   : > { %v256_v1 = vpop.xlane.xlu0 %255 }
 0x31b   : > { %526 = vrcp.f32 %v256_v1 }
 0x31d   : > { %v525_v3 = vpop.eup %524 }
 0x31e   : > { %v317_v4 = vsel %vm167_vm0, %v525_v3, 0.0 }
 0x31f   : > { %318 = vadd.xlane.f32.xlu0 %v317_v4 }
 0x321   : > { %v527_v5 = vpop.eup %526 }
 0x322   : > { %v382_v6 = vpop.xlane.xlu0 %381  ;;  %v258_v7 = vmul.f32 %v527_v5, %v521_v53 }
 0x323   : > { %528 = vrcp.f32 %v382_v6 }
 0x324   : > { %v259_v8 = vpack.c.bf16 %v258_v7, %v258_v7 }
 0x326   : > { %486 = vmatmul.msk.bf16.vlgmr.msra.gmra.mxu3 %vm167_vm0, %v259_v8 }
 0x329   : > { %v529_v9 = vpop.eup %528 }
 0x32a   : > { %v384_v10 = vmul.f32 %v529_v9, %v523_v56 }
 0x32c   : > { %v385_v11 = vpack.c.bf16 %v384_v10, %v384_v10 }
 0x32e   : > { %490 = vmatmul.msk.bf16.vlgmr.msrb.gmra.mxu2 %vm167_vm0, %v385_v11 }
 0x333   : > { %323 = vrot.lane.b32.xlu0 %v589_v2, %s550_s5 }
 0x392   : > { %v319_v12 = vpop.xlane.xlu0 %318 }
 0x393   : > { %530 = vrcp.f32 %v319_v12 }
 0x399   : > { %v531_v13 = vpop.eup %530 }
 0x39a   : > { %v321_v14 = vmul.f32 %v531_v13, %v525_v3 }
 0x39c   : > { %v322_v17 = vpack.c.bf16 %v321_v14, %v321_v14 }
 0x3a5   : > { %v324_v15 = vpop.permute.xlu0 %323 }
 0x3a6   : > { %v329_v16 = vsel %vm204_vm1, %v324_v15, 0 }
 0x3a7   : > { %338 = vmatpush.bf16.msrb.mxu3 %v329_v16 }
 0x3a9   : > { %v277_v18 = vpop.f32.mrf.mxu3 }
 0x3aa   : > { %v281_v19 = vpack.c.bf16 %v277_v18, %v277_v18  ;;  %488 = vmatmul.msk.bf16.vlgmr.msrb.gmra.mxu3 %vm167_vm0, %v322_v17 }
 0x3ac   : > { %283 = vrot.lane.b32.xlu2 %v281_v19, %s551_s6 }
 0x3b1   : > { %v279_v20 = vpop.f32.mrf.mxu3  ;;  %v403_v21 = vpop.f32.mrf.mxu2 }
 0x3b2   : > { %v407_v26 = vpack.c.bf16 %v403_v21, %v403_v21 }
 0x3b9   : > { %v405_v2 = vpop.f32.mrf.mxu2 }
 0x406   : > { %v284_v22 = vpop.permute.xlu2 %283 }
 0x407   : > { %287 = vst.msk [vmem:[%s622_s4] sm:$0xf] %vm286_vm3, %v284_v22 }
 0x42d   : > { %v340_v23 = vpop.f32.mrf.mxu3 }
 0x42e   : > { %v344_v24 = vpack.c.bf16 %v340_v23, %v340_v23 }
 0x430   : > { %346 = vrot.lane.b32.xlu1 %v344_v24, %s552_s7 }
 0x435   : > { %v342_v25 = vpop.f32.mrf.mxu3 }
 0x438   : > { %409 = vrot.lane.b32.xlu1 %v407_v26, %s553_s8 }
 0x4a2   : > { %v347_v27 = vpop.permute.xlu1 %346 }
 0x4a3   : > { %350 = vst.msk [vmem:[%s622_s4] sm:$0xf] %vm349_vm4, %v347_v27 }
 0x4aa   : > { %v410_v28 = vpop.permute.xlu1 %409 }
 0x4ab   : > { %413 = vst.msk [vmem:[%s622_s4] sm:$0xf] %vm412_vm5, %v410_v28 }
 0x4ac PF: > { %s12_s9 = sadd.s32 1, %s538_s9  }
 0x4ad   : > { %p9_p4 = scmp.ge.s32.totalorder %s12_s9, 4  }
 0x4af   :  { %11 = sbr.rel (!%p9_p4) target bundleno = 1 (0x1), region = 61 }

// kernel: encoder_forward.12
= control target key start
LH: loop header
LB: loop body
LE: loop exit
PB: predicated region body
PF: predicated region fallthrough
CT: control target
= control target key end

     0   :  { %11 = vsyncpa [#allocation5], 0  ;;  %s347_s24 = smov [#allocation4]   ;;  %s462_s0 = inlined_call_operand.vmem [shape: f32[16,32], index: 0, kind: input, shape index: {}]   ;;  %s463_s1 = inlined_call_operand.vmem [shape: bf16[32,64], index: 1, kind: input, shape index: {}]   ;;  %s464_s2 = inlined_call_operand.vmem [shape: f32[1,64], index: 2, kind: input, shape index: {}]   ;;  %s465_s3 = inlined_call_operand.vmem [shape: bf16[64,32], index: 3, kind: input, shape index: {}]   ;;  %s466_s4 = inlined_call_operand.vmem [shape: f32[1,32], index: 4, kind: input, shape index: {}]   ;;  %s467_s5 = inlined_call_operand.vmem [shape: f32[2], index: 5, kind: input, shape index: {}]   ;;  %s468_s6 = inlined_call_operand.vmem [shape: f32[16,32], index: 6, kind: output, shape index: {}]  }
   0x1   :  { %s27_s23 = sshll.u32 %s467_s5, 4  ;;  %s28_s23 = int_to_ptr.vmem [resolvable:$true] %s27_s23 }
   0x2   :  { %30 = dma.vmem_to_smem %s28_s23, 16, %s347_s24, [#allocation5]  }
   0x3   :  { %345 = dma.done.wait [#allocation5], 16  }
   0x4   :  { %346 = vsyncadd [#allocation5], 4294967280 }
   0x5   :  { %35 = sfence }
   0x6   :  { %v392_v0 = vld [vmem:[%s462_s0] sm:$0xff]  ;;  %vm43_vm0 = vcmask 261120   ;;  %v399_v2 = vld [vmem:[%s462_s0 + $0x8] sm:$0xff]  ;;  %v348_v4 = vmov 32.0   ;;  %v349_v21 = vmov 31.0   ;;  %s421_s7 = sld [smem:[#allocation4]] }
   0x7   :  { %v44_v1 = vsel %vm43_vm0, %v392_v0, 0.0  ;;  %v47_v3 = vsel %vm43_vm0, %v399_v2, 0.0  ;;  %321 = vrcp.f32 %v348_v4  ;;  %v310_v40 = vld [vmem:[%s463_s1 + $0x8] sm:$0xff]  ;;  %v309_v43 = vld [vmem:[%s463_s1] sm:$0xff]  ;;  %s423_s1 = sld [smem:[#allocation4 + $0x1]]  ;;  %vm146_vm12 = vcmask 257024  }
   0x8   :  { %45 = vadd.xlane.f32.xlu0 %v44_v1  ;;  %323 = vrcp.f32 %v349_v21  ;;  %188 = vmatpush.bf16.msra.mxu0 %v310_v40 }
   0xc   :  { %189 = vmatpush.bf16.msra.mxu0 %v309_v43  ;;  %v135_v62 = vstv %s421_s7 }
   0xd   :  { %v322_v5 = vpop.eup %321 }
   0xe   :  { %v51_v6 = vmul.f32 32.0, %v322_v5  ;;  %vm55_vm1 = vweird.f32 %v322_v5  ;;  %v324_v22 = vpop.eup %323 }
   0xf   :  { %v70_v23 = vmul.f32 31.0, %v324_v22  ;;  %vm74_vm2 = vweird.f32 %v324_v22 }
  0x10   :  { %48 = vadd.xlane.f32.xlu0 %v47_v3  ;;  %v52_v7 = vsub.f32 1.0, %v51_v6 }
  0x11   :  { %v71_v24 = vsub.f32 1.0, %v70_v23 }
  0x12   :  { %v53_v8 = vmul.f32 %v322_v5, %v52_v7 }
  0x13   :  { %v72_v25 = vmul.f32 %v324_v22, %v71_v24 }
  0x14   :  { %v54_v9 = vadd.f32 %v322_v5, %v53_v8  ;;  %v141_v8 = vstv %s423_s1 }
  0x15   :  { %v73_v26 = vadd.f32 %v324_v22, %v72_v25 }
  0x16   :  { %v56_v10 = vsel %vm55_vm1, %v322_v5, %v54_v9  ;;  %vm233_vm1 = vcmask 523264  }
  0x17   :  { %v75_v27 = vsel %vm74_vm2, %v324_v22, %v73_v26  ;;  %v314_v26 = vld [vmem:[%s465_s3 + $0x18] sm:$0xff] }
  0x18   :  { %241 = vmatpush.bf16.msra.mxu1 %v314_v26 }
  0x7b   :  { %v46_v11 = vpop.xlane.xlu0 %45 }
  0x7c   :  { %v57_v12 = vmul.f32 %v56_v10, %v46_v11 }
  0x7e   :  { %v404_v13 = vsub.f32 %v392_v0, %v57_v12 }
  0x80   :  { %v61_v14 = vmul.f32 %v404_v13, %v404_v13  ;;  %v136_v4 = vmul.f32 %v135_v62, %v404_v13 }
  0x82   :  { %v63_v15 = vsel %vm43_vm0, %v61_v14, 0.0 }
  0x83   :  { %64 = vadd.xlane.f32.xlu1 %v63_v15  ;;  %v49_v16 = vpop.xlane.xlu0 %48 }
  0x84   :  { %v58_v17 = vmul.f32 %v56_v10, %v49_v16 }
  0x86   :  { %v410_v18 = vsub.f32 %v399_v2, %v58_v17 }
  0x88   :  { %v62_v19 = vmul.f32 %v410_v18, %v410_v18  ;;  %v137_v13 = vmul.f32 %v135_v62, %v410_v18  ;;  %v312_v18 = vld [vmem:[%s465_s3 + $0x8] sm:$0xff] }
  0x8a   :  { %v66_v20 = vsel %vm43_vm0, %v62_v19, 0.0 }
  0x8b   :  { %67 = vadd.xlane.f32.xlu1 %v66_v20 }
  0xf6   :  { %v65_v28 = vpop.xlane.xlu1 %64 }
  0xf7   :  { %v76_v29 = vmul.f32 %v75_v27, %v65_v28  ;;  %v311_v28 = vld [vmem:[%s465_s3] sm:$0xff] }
  0xf9   :  { %325 = vrsqrt.f32 %v76_v29  ;;  %vm85_vm3 = vcmp.eq.f32.partialorder %v76_v29, inf  ;;  %v88_v44 = vand.u32 2147483648, %v76_v29  ;;  %vm87_vm4 = vcmp.eq.f32.partialorder %v76_v29, 0.0 }
  0xfe   :  { %v68_v30 = vpop.xlane.xlu1 %67 }
  0xff   :  { %v326_v31 = vpop.eup %325  ;;  %v77_v32 = vmul.f32 %v75_v27, %v68_v30  ;;  %v313_v27 = vld [vmem:[%s465_s3 + $0x10] sm:$0xff] }
 0x100   :  { %v79_v33 = vmul.f32 %v326_v31, %v76_v29  ;;  %242 = vmatpush.bf16.msra.mxu1 %v313_v27 }
 0x101   :  { %327 = vrsqrt.f32 %v77_v32  ;;  %vm97_vm5 = vcmp.eq.f32.partialorder %v77_v32, inf  ;;  %v100_v52 = vand.u32 2147483648, %v77_v32  ;;  %vm99_vm6 = vcmp.eq.f32.partialorder %v77_v32, 0.0 }
 0x102   :  { %v80_v34 = vmul.f32 %v326_v31, %v79_v33 }
 0x104   :  { %v81_v35 = vmul.f32 0.5, %v80_v34  ;;  %243 = vmatpush.bf16.msra.mxu1 %v312_v18 }
 0x106   :  { %v82_v36 = vsub.f32 1.5, %v81_v35 }
 0x107   :  { %v328_v37 = vpop.eup %327 }
 0x108   :  { %v83_v38 = vmul.f32 %v326_v31, %v82_v36  ;;  %v91_v39 = vmul.f32 %v328_v37, %v77_v32  ;;  %244 = vmatpush.bf16.msra.mxu1 %v311_v28  ;;  %v319_v31 = vld [vmem:[%s464_s2] ss:$0 sm:$0xff] }
 0x10a   :  { %v84_v41 = vmul.f32 %v83_v38, %v76_v29  ;;  %v92_v42 = vmul.f32 %v328_v37, %v91_v39 }
 0x10c   :  { %v86_v45 = vsel %vm85_vm3, %v76_v29, %v84_v41  ;;  %v93_v46 = vmul.f32 0.5, %v92_v42  ;;  %v350_v29 = vmov 0.0   ;;  %v320_v42 = vld [vmem:[%s466_s4] ss:$0 sm:$0xff] }
 0x10d   :  { %v89_v47 = vsel %vm87_vm4, %v88_v44, %v86_v45  ;;  %149 = vst.msk [vmem:[#allocation2] sm:$0xff] %vm43_vm0, %v350_v29 }
 0x10e   :  { %v102_v48 = vadd.f32 1e-06, %v89_v47  ;;  %v94_v49 = vsub.f32 1.5, %v93_v46  ;;  %150 = vst.msk [vmem:[#allocation2 + $0x8] sm:$0xff] %vm43_vm0, %v350_v29 }
 0x110   :  { %329 = vrcp.f32 %v102_v48  ;;  %v95_v50 = vmul.f32 %v328_v37, %v94_v49  ;;  %v115_v59 = vand.u32 2147483648, %v102_v48  ;;  %v113_v61 = vand.u32 2147483647, %v102_v48 }
 0x111   :  { %vm109_vm8 = vweird.f32 %v102_v48 }
 0x112   :  { %v96_v51 = vmul.f32 %v95_v50, %v77_v32  ;;  %v116_v1 = vor.u32 1.1754944e-38, %v115_v59  ;;  %vm114_vm10 = vcmp.eq.f32.partialorder %v113_v61, 8.507059e+37 }
 0x114   :  { %v98_v53 = vsel %vm97_vm5, %v77_v32, %v96_v51  ;;  %v198_v38 = vld [vmem:[#allocation2] sm:$0xff] }
 0x115   :  { %v101_v55 = vsel %vm99_vm6, %v100_v52, %v98_v53  ;;  %v199_v41 = vld [vmem:[#allocation2 + $0x8] sm:$0xff] }
 0x116   :  { %v330_v54 = vpop.eup %329  ;;  %v103_v57 = vadd.f32 1e-06, %v101_v55 }
 0x117   :  { %v105_v56 = vmul.f32 %v330_v54, %v102_v48  ;;  %vm110_vm7 = vweird.f32 %v330_v54 }
 0x118   :  { %331 = vrcp.f32 %v103_v57  ;;  %vm111_vm9 = vmor %vm109_vm8, %vm110_vm7  ;;  %v130_v11 = vand.u32 2147483648, %v103_v57  ;;  %v128_v15 = vand.u32 2147483647, %v103_v57  ;;  %vm124_vm13 = vweird.f32 %v103_v57 }
 0x119   :  { %v106_v58 = vsub.f32 1.0, %v105_v56 }
 0x11a   :  { %v131_v19 = vor.u32 1.1754944e-38, %v130_v11  ;;  %vm129_vm15 = vcmp.eq.f32.partialorder %v128_v15, 8.507059e+37 }
 0x11b   :  { %v107_v60 = vmul.f32 %v330_v54, %v106_v58 }
 0x11d   :  { %v108_v63 = vadd.f32 %v330_v54, %v107_v60 }
 0x11e   :  { %v332_v3 = vpop.eup %331 }
 0x11f   :  { %v112_v5 = vsel %vm111_vm9, %v330_v54, %v108_v63  ;;  %v120_v6 = vmul.f32 %v332_v3, %v103_v57  ;;  %vm125_vm11 = vweird.f32 %v332_v3 }
 0x120   :  { %v117_v7 = vsel %vm114_vm10, %v116_v1, %v112_v5  ;;  %vm126_vm14 = vmor %vm124_vm13, %vm125_vm11 }
 0x121   :  { %v138_v9 = vmul.f32 %v136_v4, %v117_v7  ;;  %v121_v10 = vsub.f32 1.0, %v120_v6 }
 0x123   :  { %v142_v12 = vadd.f32 %v141_v8, %v138_v9  ;;  %v122_v14 = vmul.f32 %v332_v3, %v121_v10 }
 0x125   :  { %v144_v16 = vpack.c.bf16 %v142_v12, %v142_v12  ;;  %v123_v17 = vadd.f32 %v332_v3, %v122_v14 }
 0x127   :  { %147 = vst.msk [vmem:[#allocation3] sm:$0xf] %vm146_vm12, %v144_v16  ;;  %v127_v20 = vsel %vm126_vm14, %v332_v3, %v123_v17 }
 0x128   :  { %v132_v21 = vsel %vm129_vm15, %v131_v19, %v127_v20 }
 0x129   :  { %v139_v22 = vmul.f32 %v137_v13, %v132_v21 }
 0x12b   :  { %v143_v23 = vadd.f32 %v141_v8, %v139_v22 }
 0x12d   :  { %v145_v24 = vpack.c.bf16 %v143_v23, %v143_v23 }
 0x12f   :  { %148 = vst.msk [vmem:[#allocation3 + $0x4] sm:$0xf] %vm146_vm12, %v145_v24 }
 0x136   :  { %v308_v25 = vld [vmem:[#allocation3] sm:$0xff] }
 0x137   :  { %290 = vmatmul.msk.bf16.vlgmr.msra.gmra.mxu0 %vm43_vm0, %v308_v25 }
 0x1b4   :  { %v191_v30 = vpop.f32.mrf.mxu0 }
 0x1b5   :  { %v192_v32 = vadd.f32 %v319_v31, %v191_v30 }
 0x1b7   :  { %v196_v35 = vmax.f32 %v192_v32, 0.0 }
 0x1bc   :  { %v193_v33 = vpop.f32.mrf.mxu0 }
 0x1bd   :  { %v194_v34 = vadd.f32 %v319_v31, %v193_v33 }
 0x1bf   :  { %v197_v36 = vmax.f32 %v194_v34, 0.0 }
 0x1c1   :  { %v200_v37 = vpack.c.bf16 %v197_v36, %v196_v35 }
 0x1c3   :  { %307 = vmatmul.msk.bf16.vlgmr.msra.gmra.mxu1 %vm233_vm1, %v200_v37 }
 0x240   :  { %v246_v39 = vpop.f32.mrf.mxu1 }
 0x241   :  { %v251_v40 = vadd.f32 %v246_v39, %v198_v38 }
 0x243   :  { %253 = vst.msk [vmem:[#allocation2] sm:$0xff] %vm43_vm0, %v251_v40 }
 0x248   :  { %v248_v43 = vpop.f32.mrf.mxu1 }
 0x249   :  { %v252_v44 = vadd.f32 %v248_v43, %v199_v41 }
 0x24a   :  { %v258_v45 = vld [vmem:[#allocation2] sm:$0xff] }
 0x24b   :  { %v264_v46 = vadd.f32 %v320_v42, %v258_v45  ;;  %254 = vst.msk [vmem:[#allocation2 + $0x8] sm:$0xff] %vm43_vm0, %v252_v44 }
 0x24d   :  { %v268_v47 = vadd.f32 %v264_v46, %v392_v0 }
 0x24f   :  { %270 = vst.msk [vmem:[%s468_s6] sm:$0xff] %vm43_vm0, %v268_v47 }
 0x252   :  { %v259_v48 = vld [vmem:[#allocation2 + $0x8] sm:$0xff] }
 0x253   :  { %v265_v49 = vadd.f32 %v320_v42, %v259_v48 }
 0x255   :  { %v269_v50 = vadd.f32 %v265_v49, %v399_v2 }
 0x257   :  { %271 = vst.msk [vmem:[%s468_s6 + $0x8] sm:$0xff] %vm43_vm0, %v269_v50 }
 0x258   :  { %276 = vsyncpa [#allocation5], 1 }

// kernel: encoder_forward.15
= control target key start
LH: loop header
LB: loop body
LE: loop exit
PB: predicated region body
PF: predicated region fallthrough
CT: control target
= control target key end

     0   :  { %9 = vsyncpa [#allocation3], 0  ;;  %s136_s18 = smov [#allocation2]   ;;  %s137_s20 = smov 64   ;;  %s185_s0 = inlined_call_operand.vmem [shape: bf16[16,32], index: 0, kind: input, shape index: {}]   ;;  %s186_s1 = inlined_call_operand.hbm [shape: bf16[32,32], index: 1, kind: input, shape index: {}]   ;;  %s187_s2 = inlined_call_operand.vmem [shape: f32[1,32], index: 2, kind: input, shape index: {}]   ;;  %s188_s3 = inlined_call_operand.vmem [shape: f32[16,32], index: 3, kind: input, shape index: {}]   ;;  %s189_s4 = inlined_call_operand.vmem [shape: f32[16,32], index: 4, kind: output, shape index: {}]  }
   0x1   :  { %s16_s17 = sshll.u32 %s186_s1, 4  ;;  %s18_s19 = sshll.u32 %s136_s18, 4  ;;  %s17_s17 = int_to_ptr.hbm [resolvable:$true] %s16_s17  ;;  %s19_s19 = int_to_ptr.vmem [resolvable:$true] %s18_s19 }
   0x2   :  { %s138_s21 = smov 4  }
   0x3   :  { %24 = dma.hbm_to_vmem [thread:$0]  %s17_s17, 256, %s19_s19, [#allocation3], %s137_s20, %s137_s20, %s138_s21  }
   0x4   :  { %134 = dma.done.wait [#allocation3], 256  }
   0x5   :  { %135 = vsyncadd [#allocation3], 4294967040  ;;  %v105_v0 = vld [vmem:[#allocation2 + $0x8] sm:$0xff]  ;;  %v104_v1 = vld [vmem:[#allocation2] sm:$0xff]  ;;  %vm61_vm0 = vcmask 261120  }
   0x6   :  { %71 = vmatpush.bf16.msra.mxu0 %v105_v0  ;;  %v103_v2 = vld [vmem:[%s185_s0] sm:$0xff]  ;;  %v80_v9 = vld [vmem:[%s188_s3 + $0x8] sm:$0xff] }
   0x7   :  { %v109_v3 = vld [vmem:[%s187_s2] ss:$0 sm:$0xff] }
   0x8   :  { %v79_v5 = vld [vmem:[%s188_s3] sm:$0xff] }
   0xa   :  { %72 = vmatpush.bf16.msra.mxu0 %v104_v1 }
   0xd   :  { %102 = vmatmul.msk.bf16.vlgmr.msra.gmra.mxu0 %vm61_vm0, %v103_v2 }
  0x8a   :  { %v74_v4 = vpop.f32.mrf.mxu0 }
  0x8b   :  { %v75_v6 = vadd.f32 %v109_v3, %v74_v4 }
  0x8d   :  { %v81_v7 = vadd.f32 %v79_v5, %v75_v6 }
  0x8f   :  { %83 = vst.msk [vmem:[%s189_s4] sm:$0xff] %vm61_vm0, %v81_v7 }
  0x92   :  { %v76_v8 = vpop.f32.mrf.mxu0 }
  0x93   :  { %v77_v10 = vadd.f32 %v109_v3, %v76_v8 }
  0x95   :  { %v82_v11 = vadd.f32 %v80_v9, %v77_v10 }
  0x97   :  { %84 = vst.msk [vmem:[%s189_s4 + $0x8] sm:$0xff] %vm61_vm0, %v82_v11 }
  0x98   :  { %89 = vsyncpa [#allocation3], 1 }

// kernel: encoder_forward.13
= control target key start
LH: loop header
LB: loop body
LE: loop exit
PB: predicated region body
PF: predicated region fallthrough
CT: control target
= control target key end

     0   :  { %9 = vsyncpa [#allocation4], 0  ;;  %s245_s18 = smov [#allocation3]   ;;  %s318_s0 = inlined_call_operand.vmem [shape: f32[16,32], index: 0, kind: input, shape index: {}]   ;;  %s319_s1 = inlined_call_operand.vmem [shape: bf16[32,96], index: 1, kind: input, shape index: {}]   ;;  %s320_s2 = inlined_call_operand.vmem [shape: f32[1,96], index: 2, kind: input, shape index: {}]   ;;  %s321_s3 = inlined_call_operand.vmem [shape: f32[2], index: 3, kind: input, shape index: {}]   ;;  %s322_s4 = inlined_call_operand.vmem [shape: bf16[16,96], index: 4, kind: output, shape index: {}]  }
   0x1   :  { %s21_s17 = sshll.u32 %s321_s3, 4  ;;  %s22_s17 = int_to_ptr.vmem [resolvable:$true] %s21_s17 }
   0x2   :  { %24 = dma.vmem_to_smem %s22_s17, 16, %s245_s18, [#allocation4]  }
   0x3   :  { %243 = dma.done.wait [#allocation4], 16  }
   0x4   :  { %244 = vsyncadd [#allocation4], 4294967280 }
   0x5   :  { %29 = sfence }
   0x6   :  { %v35_v0 = vld [vmem:[%s318_s0] sm:$0xff]  ;;  %vm37_vm0 = vcmask 261120   ;;  %v36_v2 = vld [vmem:[%s318_s0 + $0x8] sm:$0xff]  ;;  %v246_v4 = vmov 32.0   ;;  %v247_v21 = vmov 31.0   ;;  %s300_s25 = sld [smem:[#allocation3]] }
   0x7   :  { %v38_v1 = vsel %vm37_vm0, %v35_v0, 0.0  ;;  %v41_v3 = vsel %vm37_vm0, %v36_v2, 0.0  ;;  %219 = vrcp.f32 %v246_v4  ;;  %v214_v40 = vld [vmem:[%s319_s1 + $0x8] sm:$0xff]  ;;  %v213_v43 = vld [vmem:[%s319_s1] sm:$0xff]  ;;  %s302_s1 = sld [smem:[#allocation3 + $0x1]]  ;;  %vm140_vm12 = vcmask 257024  }
   0x8   :  { %39 = vadd.xlane.f32.xlu0 %v38_v1  ;;  %221 = vrcp.f32 %v247_v21  ;;  %180 = vmatpush.bf16.msra.mxu0 %v214_v40 }
   0xc   :  { %181 = vmatpush.bf16.msra.mxu0 %v213_v43  ;;  %v129_v62 = vstv %s300_s25 }
   0xd   :  { %v220_v5 = vpop.eup %219 }
   0xe   :  { %v45_v6 = vmul.f32 32.0, %v220_v5  ;;  %vm49_vm1 = vweird.f32 %v220_v5  ;;  %v222_v22 = vpop.eup %221 }
   0xf   :  { %v64_v23 = vmul.f32 31.0, %v222_v22  ;;  %vm68_vm2 = vweird.f32 %v222_v22 }
  0x10   :  { %42 = vadd.xlane.f32.xlu0 %v41_v3  ;;  %v46_v7 = vsub.f32 1.0, %v45_v6  ;;  %v135_v6 = vstv %s302_s1 }
  0x11   :  { %v65_v24 = vsub.f32 1.0, %v64_v23 }
  0x12   :  { %v47_v8 = vmul.f32 %v220_v5, %v46_v7 }
  0x13   :  { %v66_v25 = vmul.f32 %v222_v22, %v65_v24  ;;  %v218_v24 = vld [vmem:[%s320_s2] ss:$0 sm:$0xff] }
  0x14   :  { %v48_v9 = vadd.f32 %v220_v5, %v47_v8 }
  0x15   :  { %v67_v26 = vadd.f32 %v222_v22, %v66_v25 }
  0x16   :  { %v50_v10 = vsel %vm49_vm1, %v220_v5, %v48_v9  ;;  %vm190_vm1 = vcmask 781312  }
  0x17   :  { %v69_v27 = vsel %vm68_vm2, %v222_v22, %v67_v26 }
  0x7b   :  { %v40_v11 = vpop.xlane.xlu0 %39 }
  0x7c   :  { %v51_v12 = vmul.f32 %v50_v10, %v40_v11 }
  0x7e   :  { %v284_v13 = vsub.f32 %v35_v0, %v51_v12 }
  0x80   :  { %v55_v14 = vmul.f32 %v284_v13, %v284_v13 }
  0x82   :  { %v57_v15 = vsel %vm37_vm0, %v55_v14, 0.0 }
  0x83   :  { %58 = vadd.xlane.f32.xlu1 %v57_v15  ;;  %v43_v16 = vpop.xlane.xlu0 %42 }
  0x84   :  { %v52_v17 = vmul.f32 %v50_v10, %v43_v16 }
  0x86   :  { %v289_v18 = vsub.f32 %v36_v2, %v52_v17  ;;  %v130_v2 = vmul.f32 %v129_v62, %v284_v13 }
  0x88   :  { %v56_v19 = vmul.f32 %v289_v18, %v289_v18  ;;  %v131_v13 = vmul.f32 %v129_v62, %v289_v18 }
  0x8a   :  { %v60_v20 = vsel %vm37_vm0, %v56_v19, 0.0 }
  0x8b   :  { %61 = vadd.xlane.f32.xlu1 %v60_v20 }
  0xf6   :  { %v59_v28 = vpop.xlane.xlu1 %58 }
  0xf7   :  { %v70_v29 = vmul.f32 %v69_v27, %v59_v28 }
  0xf9   :  { %223 = vrsqrt.f32 %v70_v29  ;;  %vm79_vm3 = vcmp.eq.f32.partialorder %v70_v29, inf  ;;  %v82_v44 = vand.u32 2147483648, %v70_v29  ;;  %vm81_vm4 = vcmp.eq.f32.partialorder %v70_v29, 0.0 }
  0xfe   :  { %v62_v30 = vpop.xlane.xlu1 %61 }
  0xff   :  { %v224_v31 = vpop.eup %223  ;;  %v71_v32 = vmul.f32 %v69_v27, %v62_v30 }
 0x100   :  { %v73_v33 = vmul.f32 %v224_v31, %v70_v29 }
 0x101   :  { %225 = vrsqrt.f32 %v71_v32  ;;  %vm91_vm5 = vcmp.eq.f32.partialorder %v71_v32, inf  ;;  %v94_v52 = vand.u32 2147483648, %v71_v32  ;;  %vm93_vm6 = vcmp.eq.f32.partialorder %v71_v32, 0.0 }
 0x102   :  { %v74_v34 = vmul.f32 %v224_v31, %v73_v33 }
 0x104   :  { %v75_v35 = vmul.f32 0.5, %v74_v34 }
 0x106   :  { %v76_v36 = vsub.f32 1.5, %v75_v35 }
 0x107   :  { %v226_v37 = vpop.eup %225 }
 0x108   :  { %v77_v38 = vmul.f32 %v224_v31, %v76_v36  ;;  %v85_v39 = vmul.f32 %v226_v37, %v71_v32 }
 0x10a   :  { %v78_v41 = vmul.f32 %v77_v38, %v70_v29  ;;  %v86_v42 = vmul.f32 %v226_v37, %v85_v39 }
 0x10c   :  { %v80_v45 = vsel %vm79_vm3, %v70_v29, %v78_v41  ;;  %v87_v46 = vmul.f32 0.5, %v86_v42 }
 0x10d   :  { %v83_v47 = vsel %vm81_vm4, %v82_v44, %v80_v45 }
 0x10e   :  { %v96_v48 = vadd.f32 1e-06, %v83_v47  ;;  %v88_v49 = vsub.f32 1.5, %v87_v46 }
 0x110   :  { %227 = vrcp.f32 %v96_v48  ;;  %v89_v50 = vmul.f32 %v226_v37, %v88_v49  ;;  %v109_v59 = vand.u32 2147483648, %v96_v48  ;;  %v107_v61 = vand.u32 2147483647, %v96_v48 }
 0x111   :  { %vm103_vm8 = vweird.f32 %v96_v48 }
 0x112   :  { %v90_v51 = vmul.f32 %v89_v50, %v71_v32  ;;  %v110_v0 = vor.u32 1.1754944e-38, %v109_v59  ;;  %vm108_vm10 = vcmp.eq.f32.partialorder %v107_v61, 8.507059e+37 }
 0x114   :  { %v92_v53 = vsel %vm91_vm5, %v71_v32, %v90_v51 }
 0x115   :  { %v95_v55 = vsel %vm93_vm6, %v94_v52, %v92_v53 }
 0x116   :  { %v228_v54 = vpop.eup %227  ;;  %v97_v57 = vadd.f32 1e-06, %v95_v55 }
 0x117   :  { %v99_v56 = vmul.f32 %v228_v54, %v96_v48  ;;  %vm104_vm7 = vweird.f32 %v228_v54 }
 0x118   :  { %229 = vrcp.f32 %v97_v57  ;;  %vm105_vm9 = vmor %vm103_vm8, %vm104_vm7  ;;  %v124_v9 = vand.u32 2147483648, %v97_v57  ;;  %v122_v12 = vand.u32 2147483647, %v97_v57  ;;  %vm118_vm13 = vweird.f32 %v97_v57 }
 0x119   :  { %v100_v58 = vsub.f32 1.0, %v99_v56 }
 0x11a   :  { %v125_v16 = vor.u32 1.1754944e-38, %v124_v9  ;;  %vm123_vm15 = vcmp.eq.f32.partialorder %v122_v12, 8.507059e+37 }
 0x11b   :  { %v101_v60 = vmul.f32 %v228_v54, %v100_v58 }
 0x11d   :  { %v102_v63 = vadd.f32 %v228_v54, %v101_v60 }
 0x11e   :  { %v230_v1 = vpop.eup %229 }
 0x11f   :  { %v106_v3 = vsel %vm105_vm9, %v228_v54, %v102_v63  ;;  %v114_v4 = vmul.f32 %v230_v1, %v97_v57  ;;  %vm119_vm11 = vweird.f32 %v230_v1 }
 0x120   :  { %v111_v5 = vsel %vm108_vm10, %v110_v0, %v106_v3  ;;  %vm120_vm14 = vmor %vm118_vm13, %vm119_vm11 }
 0x121   :  { %v132_v7 = vmul.f32 %v130_v2, %v111_v5  ;;  %v115_v8 = vsub.f32 1.0, %v114_v4 }
 0x123   :  { %v136_v10 = vadd.f32 %v135_v6, %v132_v7  ;;  %v116_v11 = vmul.f32 %v230_v1, %v115_v8 }
 0x125   :  { %v138_v14 = vpack.c.bf16 %v136_v10, %v136_v10  ;;  %v117_v15 = vadd.f32 %v230_v1, %v116_v11 }
 0x127   :  { %141 = vst.msk [vmem:[#allocation2] sm:$0xf] %vm140_vm12, %v138_v14  ;;  %v121_v17 = vsel %vm120_vm14, %v230_v1, %v117_v15 }
 0x128   :  { %v126_v19 = vsel %vm123_vm15, %v125_v16, %v121_v17 }
 0x129   :  { %v133_v20 = vmul.f32 %v131_v13, %v126_v19 }
 0x12b   :  { %v137_v21 = vadd.f32 %v135_v6, %v133_v20 }
 0x12d   :  { %v139_v22 = vpack.c.bf16 %v137_v21, %v137_v21 }
 0x12f   :  { %142 = vst.msk [vmem:[#allocation2 + $0x4] sm:$0xf] %vm140_vm12, %v139_v22 }
 0x136   :  { %v212_v23 = vld [vmem:[#allocation2] sm:$0xff] }
 0x137   :  { %211 = vmatmul.msk.bf16.vlgmr.msra.gmra.mxu0 %vm37_vm0, %v212_v23 }
 0x1b4   :  { %v183_v25 = vpop.f32.mrf.mxu0 }
 0x1b5   :  { %v184_v26 = vadd.f32 %v218_v24, %v183_v25 }
 0x1b7   :  { %v188_v27 = vpack.c.bf16 %v184_v26, %v184_v26 }
 0x1b9   :  { %191 = vst.msk [vmem:[%s322_s4] sm:$0xf] %vm190_vm1, %v188_v27 }
 0x1bc   :  { %v185_v18 = vpop.f32.mrf.mxu0 }
 0x1bd   :  { %v186_v28 = vadd.f32 %v218_v24, %v185_v18 }
 0x1bf   :  { %v189_v29 = vpack.c.bf16 %v186_v28, %v186_v28 }
 0x1c1   :  { %192 = vst.msk [vmem:[%s322_s4 + $0x4] sm:$0xf] %vm190_vm1, %v189_v29 }
 0x1c2   :  { %197 = vsyncpa [#allocation4], 1 }

// kernel: encoder_forward.17
= control target key start
LH: loop header
LB: loop body
LE: loop exit
PB: predicated region body
PF: predicated region fallthrough
CT: control target
= control target key end

     0   :  { %7 = vsyncpa [#allocation4], 0  ;;  %s263_s0 = inlined_call_operand.vmem [shape: f32[16,32], index: 0, kind: input, shape index: {}]   ;;  %s264_s1 = inlined_call_operand.vmem [shape: f32[2], index: 1, kind: input, shape index: {}]   ;;  %s265_s2 = inlined_call_operand.hbm [shape: f32[16,32], index: 2, kind: output, shape index: {}]  }
   0x1   :  { %8 = vsyncpa [#allocation3], 0  ;;  %s16_s11 = sshll.u32 %s264_s1, 4  ;;  %s208_s12 = smov [#allocation2]   ;;  %s17_s11 = int_to_ptr.vmem [resolvable:$true] %s16_s11 }
   0x2   :  { %19 = dma.vmem_to_smem %s17_s11, 16, %s208_s12, [#allocation4]  }
   0x3   :  { %204 = dma.done.wait [#allocation4], 16  }
   0x4   :  { %205 = vsyncadd [#allocation4], 4294967280 }
   0x5   :  { %24 = sfence }
   0x6   :  { %v25_v0 = vld [vmem:[%s263_s0] sm:$0xff]  ;;  %vm27_vm0 = vcmask 261120   ;;  %v26_v2 = vld [vmem:[%s263_s0 + $0x8] sm:$0xff]  ;;  %v209_v4 = vmov 32.0   ;;  %v210_v21 = vmov 31.0   ;;  %s250_s0 = sld [smem:[#allocation2]] }
   0x7   :  { %v28_v1 = vsel %vm27_vm0, %v25_v0, 0.0  ;;  %v31_v3 = vsel %vm27_vm0, %v26_v2, 0.0  ;;  %156 = vrcp.f32 %v209_v4  ;;  %s252_s1 = sld [smem:[#allocation2 + $0x1]]  ;;  %s211_s17 = smov [#allocation5]  }
   0x8   :  { %29 = vadd.xlane.f32.xlu0 %v28_v1  ;;  %158 = vrcp.f32 %v210_v21  ;;  %s134_s18 = sshll.u32 %s211_s17, 4  ;;  %s136_s21 = sshll.u32 %s265_s2, 4  ;;  %s135_s18 = int_to_ptr.vmem [resolvable:$true] %s134_s18  ;;  %s137_s21 = int_to_ptr.hbm [resolvable:$true] %s136_s21 }
   0x9   :  { %s212_s22 = smov 128   ;;  %s213_s23 = smov 8  }
   0xc   :  { %v119_v60 = vstv %s250_s0 }
   0xd   :  { %v157_v5 = vpop.eup %156  ;;  %v125_v4 = vstv %s252_s1 }
   0xe   :  { %v35_v6 = vmul.f32 32.0, %v157_v5  ;;  %vm39_vm1 = vweird.f32 %v157_v5  ;;  %v159_v22 = vpop.eup %158 }
   0xf   :  { %v54_v23 = vmul.f32 31.0, %v159_v22  ;;  %vm58_vm2 = vweird.f32 %v159_v22 }
  0x10   :  { %32 = vadd.xlane.f32.xlu0 %v31_v3  ;;  %v36_v7 = vsub.f32 1.0, %v35_v6 }
  0x11   :  { %v55_v24 = vsub.f32 1.0, %v54_v23 }
  0x12   :  { %v37_v8 = vmul.f32 %v157_v5, %v36_v7 }
  0x13   :  { %v56_v25 = vmul.f32 %v159_v22, %v55_v24 }
  0x14   :  { %v38_v9 = vadd.f32 %v157_v5, %v37_v8 }
  0x15   :  { %v57_v26 = vadd.f32 %v159_v22, %v56_v25 }
  0x16   :  { %v40_v10 = vsel %vm39_vm1, %v157_v5, %v38_v9 }
  0x17   :  { %v59_v27 = vsel %vm58_vm2, %v159_v22, %v57_v26 }
  0x7b   :  { %v30_v11 = vpop.xlane.xlu0 %29 }
  0x7c   :  { %v41_v12 = vmul.f32 %v40_v10, %v30_v11 }
  0x7e   :  { %v240_v13 = vsub.f32 %v25_v0, %v41_v12 }
  0x80   :  { %v45_v14 = vmul.f32 %v240_v13, %v240_v13  ;;  %v120_v0 = vmul.f32 %v119_v60, %v240_v13 }
  0x82   :  { %v47_v15 = vsel %vm27_vm0, %v45_v14, 0.0 }
  0x83   :  { %48 = vadd.xlane.f32.xlu1 %v47_v15  ;;  %v33_v16 = vpop.xlane.xlu0 %32 }
  0x84   :  { %v42_v17 = vmul.f32 %v40_v10, %v33_v16 }
  0x86   :  { %v245_v18 = vsub.f32 %v26_v2, %v42_v17 }
  0x88   :  { %v46_v19 = vmul.f32 %v245_v18, %v245_v18  ;;  %v121_v13 = vmul.f32 %v119_v60, %v245_v18 }
  0x8a   :  { %v50_v20 = vsel %vm27_vm0, %v46_v19, 0.0 }
  0x8b   :  { %51 = vadd.xlane.f32.xlu1 %v50_v20 }
  0xf6   :  { %v49_v28 = vpop.xlane.xlu1 %48 }
  0xf7   :  { %v60_v29 = vmul.f32 %v59_v27, %v49_v28 }
  0xf9   :  { %160 = vrsqrt.f32 %v60_v29  ;;  %vm69_vm3 = vcmp.eq.f32.partialorder %v60_v29, inf  ;;  %v72_v42 = vand.u32 2147483648, %v60_v29  ;;  %vm71_vm4 = vcmp.eq.f32.partialorder %v60_v29, 0.0 }
  0xfe   :  { %v52_v30 = vpop.xlane.xlu1 %51 }
  0xff   :  { %v161_v31 = vpop.eup %160  ;;  %v61_v32 = vmul.f32 %v59_v27, %v52_v30 }
 0x100   :  { %v63_v33 = vmul.f32 %v161_v31, %v60_v29 }
 0x101   :  { %162 = vrsqrt.f32 %v61_v32  ;;  %vm81_vm5 = vcmp.eq.f32.partialorder %v61_v32, inf  ;;  %v84_v50 = vand.u32 2147483648, %v61_v32  ;;  %vm83_vm6 = vcmp.eq.f32.partialorder %v61_v32, 0.0 }
 0x102   :  { %v64_v34 = vmul.f32 %v161_v31, %v63_v33 }
 0x104   :  { %v65_v35 = vmul.f32 0.5, %v64_v34 }
 0x106   :  { %v66_v36 = vsub.f32 1.5, %v65_v35 }
 0x107   :  { %v163_v37 = vpop.eup %162 }
 0x108   :  { %v67_v38 = vmul.f32 %v161_v31, %v66_v36  ;;  %v75_v39 = vmul.f32 %v163_v37, %v61_v32 }
 0x10a   :  { %v68_v40 = vmul.f32 %v67_v38, %v60_v29  ;;  %v76_v41 = vmul.f32 %v163_v37, %v75_v39 }
 0x10c   :  { %v70_v43 = vsel %vm69_vm3, %v60_v29, %v68_v40  ;;  %v77_v44 = vmul.f32 0.5, %v76_v41 }
 0x10d   :  { %v73_v45 = vsel %vm71_vm4, %v72_v42, %v70_v43 }
 0x10e   :  { %v86_v46 = vadd.f32 1e-06, %v73_v45  ;;  %v78_v47 = vsub.f32 1.5, %v77_v44 }
 0x110   :  { %164 = vrcp.f32 %v86_v46  ;;  %v79_v48 = vmul.f32 %v163_v37, %v78_v47  ;;  %v99_v57 = vand.u32 2147483648, %v86_v46  ;;  %v97_v59 = vand.u32 2147483647, %v86_v46 }
 0x111   :  { %vm93_vm8 = vweird.f32 %v86_v46 }
 0x112   :  { %v80_v49 = vmul.f32 %v79_v48, %v61_v32  ;;  %v100_v63 = vor.u32 1.1754944e-38, %v99_v57  ;;  %vm98_vm10 = vcmp.eq.f32.partialorder %v97_v59, 8.507059e+37 }
 0x114   :  { %v82_v51 = vsel %vm81_vm5, %v61_v32, %v80_v49 }
 0x115   :  { %v85_v52 = vsel %vm83_vm6, %v84_v50, %v82_v51 }
 0x116   :  { %v165_v53 = vpop.eup %164  ;;  %v87_v54 = vadd.f32 1e-06, %v85_v52 }
 0x117   :  { %v89_v55 = vmul.f32 %v165_v53, %v86_v46  ;;  %vm94_vm7 = vweird.f32 %v165_v53 }
 0x118   :  { %166 = vrcp.f32 %v87_v54  ;;  %vm95_vm9 = vmor %vm93_vm8, %vm94_vm7  ;;  %v114_v7 = vand.u32 2147483648, %v87_v54  ;;  %v112_v9 = vand.u32 2147483647, %v87_v54  ;;  %vm108_vm12 = vweird.f32 %v87_v54 }
 0x119   :  { %v90_v56 = vsub.f32 1.0, %v89_v55 }
 0x11a   :  { %v115_v12 = vor.u32 1.1754944e-38, %v114_v7  ;;  %vm113_vm14 = vcmp.eq.f32.partialorder %v112_v9, 8.507059e+37 }
 0x11b   :  { %v91_v58 = vmul.f32 %v165_v53, %v90_v56 }
 0x11d   :  { %v92_v61 = vadd.f32 %v165_v53, %v91_v58 }
 0x11e   :  { %v167_v62 = vpop.eup %166 }
 0x11f   :  { %v96_v1 = vsel %vm95_vm9, %v165_v53, %v92_v61  ;;  %v104_v2 = vmul.f32 %v167_v62, %v87_v54  ;;  %vm109_vm11 = vweird.f32 %v167_v62 }
 0x120   :  { %v101_v3 = vsel %vm98_vm10, %v100_v63, %v96_v1  ;;  %vm110_vm13 = vmor %vm108_vm12, %vm109_vm11 }
 0x121   :  { %v105_v5 = vsub.f32 1.0, %v104_v2  ;;  %v122_v6 = vmul.f32 %v120_v0, %v101_v3 }
 0x123   :  { %v106_v8 = vmul.f32 %v167_v62, %v105_v5  ;;  %v126_v10 = vadd.f32 %v125_v4, %v122_v6 }
 0x125   :  { %v107_v11 = vadd.f32 %v167_v62, %v106_v8  ;;  %128 = vst.msk [vmem:[#allocation5] sm:$0xff] %vm27_vm0, %v126_v10 }
 0x127   :  { %v111_v14 = vsel %vm110_vm13, %v167_v62, %v107_v11 }
 0x128   :  { %v116_v15 = vsel %vm113_vm14, %v115_v12, %v111_v14 }
 0x129   :  { %v123_v16 = vmul.f32 %v121_v13, %v116_v15 }
 0x12b   :  { %v127_v17 = vadd.f32 %v125_v4, %v123_v16 }
 0x12d   :  { %129 = vst.msk [vmem:[#allocation5 + $0x8] sm:$0xff] %vm27_vm0, %v127_v17 }
 0x12e   :  { %142 = dma.vmem_to_hbm [thread:$0]  %s135_s18, 256, %s137_s21, [#allocation3], %s212_s22, %s212_s22, %s213_s23  }
 0x12f   :  { %206 = dma.done.wait [#allocation3], 256  }
 0x130   :  { %207 = vsyncadd [#allocation3], 4294967040 }
 0x131   :  { %147 = vsyncpa [#allocation3], 1 }
 0x132   :  { %148 = vsyncpa [#allocation4], 1 }

</bundles_post_ra>
